<compile_context>
chip_gen: v5e
topology: v5e:2x2
jax: 0.10.0
libtpu: 0.0.40
codegen_flags: <defaults>
</compile_context>

<pallas_src>
import functools

import jax
import jax.numpy as jnp
from jax.experimental import pallas as pl
from jax.experimental.pallas import tpu as pltpu  # noqa: F401  (TPU backend)


# (name, output width) of the seven last-hidden heads, in the PyTorch return order.
HEAD_DIMS = (
    ("group_emotion", 9),
    ("group_emotion_category", 3),
    ("class_emotion", 9),
    ("class_valence", 1),
    ("class_arousal", 1),
    ("event_emotion", 10),
    ("event", 10),
)
HEADS_TOTAL = sum(d for _, d in HEAD_DIMS)


# ----------------------------------------------------------------------------------
# Fused single-pass kernel: embedding -> e_layers x (attention + residual) -> heads
# ----------------------------------------------------------------------------------
def fused_forward_kernel(x_ref, emb_w_ref, posb_ref,
                         ln1g_ref, ln1b_ref, weff_ref, beff_ref,
                         ln2g_ref, ln2b_ref, wqkv_ref, wproj_ref, bproj_ref,
                         keep_ref, bmask_ref, segt_ref, expc_ref, lastsel_ref,
                         wts_ref, bts_ref, wh_ref, bh_ref,
                         ts_ref, cat_ref,
                         *, num_heads, n_layers):
    eps = 1e-5
    bf16 = jnp.bfloat16
    f32 = jnp.float32
    B, S, E = x_ref.shape
    C = emb_w_ref.shape[1]
    H = num_heads
    M = B * S
    PAD = wqkv_ref.shape[-1] // 3       # 128-aligned width of each q/k/v column block

    # ---- DataEmbedding: Conv1d(k=1) as a matmul; conv bias folded into pos encoding ----
    x2 = x_ref[...].reshape(M, E).astype(bf16)
    pos = jnp.concatenate([posb_ref[...]] * B, axis=0)                      # (M, C) f32
    enc = jnp.dot(x2, emb_w_ref[...], preferred_element_type=f32) + pos     # (M, C) f32
    # TODO(synk): embedding / attention / projection dropout are identity at inference.

    keep = keep_ref[...]       # (H*M, PAD) bf16  per-head channel mask (zero padded)
    bmask = bmask_ref[...]     # (M, H*M)  f32    additive cross-batch mask (0 / -1e30)
    segt = segt_ref[...]       # (H*M, H)  f32    one-hot: score column -> head
    expc = expc_ref[...]       # (H, PAD)  f32    one-hot: head -> context channels

    def layernorm(z, g, b):
        # single-pass statistics (two independent reductions), f32 arithmetic.
        mu = jnp.mean(z, axis=-1, keepdims=True)
        ms = jnp.mean(z * z, axis=-1, keepdims=True)
        inv = jax.lax.rsqrt(ms - mu * mu + eps)
        return (z - mu) * inv * g + b

    for l in range(n_layers):            # unrolled: e_layers is small & static
        xn = layernorm(enc, ln1g_ref[l], ln1b_ref[l])
        # fold-mean + pre_proj + combine_proj collapsed host-side into one matmul.
        h = jnp.dot(xn.astype(bf16), weff_ref[l],
                    preferred_element_type=f32) + beff_ref[l]
        h = layernorm(h, ln2g_ref[l], ln2b_ref[l])
        hb = h.astype(bf16)

        # one fused qkv projection (qkv_bias=False); softmax scale pre-folded into the
        # q block.  Each of q/k/v sits in its own 128-aligned zero-padded column block
        # so the splits below are whole lane-tile slices (no unaligned lane shifts).
        qkv = jnp.dot(hb, wqkv_ref[l], preferred_element_type=f32)          # (M, 3*PAD)
        q = qkv[:, 0 * PAD:1 * PAD].astype(bf16)                            # (M, PAD)
        k = qkv[:, 1 * PAD:2 * PAD].astype(bf16)
        v = qkv[:, 2 * PAD:3 * PAD].astype(bf16)

        # head-batched attention: replicate K/V once per head along the row dim (in
        # bf16) and zero-mask each replica to its head's channels -> ONE score matmul
        # and ONE P@V matmul cover every head; no per-head loop, no reassembly.
        k_big = jnp.concatenate([k] * H, axis=0) * keep                     # (H*M, PAD)
        v_big = jnp.concatenate([v] * H, axis=0) * keep

        s = jax.lax.dot_general(q, k_big, (((1,), (1,)), ((), ())),
                                preferred_element_type=f32)                 # (M, H*M)
        s = s + bmask                            # block attention across batch elements
        # TODO(synk): shift uses the row-global max (constant inside every head segment,
        # hence softmax-exact); switch to a per-segment max if head logit ranges ever
        # diverge by >~80.
        s = s - jnp.max(s, axis=-1, keepdims=True)
        p = jnp.exp(s)                                                      # un-normalized
        den = jnp.dot(p, segt, preferred_element_type=f32)                  # (M, H) exact sums
        rinv = pl.reciprocal(den, approx=True)                              # compact EUP recip

        ctx = jnp.dot(p.astype(bf16), v_big, preferred_element_type=f32)    # (M, PAD)
        ctx = ctx * jnp.dot(rinv, expc, preferred_element_type=f32)         # per-head normalize

        out = jnp.dot(ctx.astype(bf16), wproj_ref[l],
                      preferred_element_type=f32) + bproj_ref[l]            # (M, C)
        enc = enc + out                                                     # residual

    # ---- time-series projection (all positions) + the 7 last-hidden heads ----
    encb = enc.astype(bf16)
    ts = jnp.dot(encb, wts_ref[...], preferred_element_type=f32) + bts_ref[...]
    ts_ref[...] = ts.reshape(B, S, E)
    last = jnp.dot(lastsel_ref[...], enc, preferred_element_type=f32)       # (B, C) last token
    cat_ref[...] = (jnp.dot(last.astype(bf16), wh_ref[...],
                            preferred_element_type=f32) + bh_ref[...])


# ----------------------------------------------------------------------------------
# Host-side helpers
# ----------------------------------------------------------------------------------
def positional_encoding_1d(seq_len, channels):
    """PositionalEncoding1D (channels even): interleaved [sin f0, cos f0, sin f1, ...]."""
    inv_freq = 1.0 / (10000.0 ** (jnp.arange(0, channels, 2, dtype=jnp.float32) / channels))
    sin_inp = jnp.arange(seq_len, dtype=jnp.float32)[:, None] * inv_freq[None, :]
    emb = jnp.stack([jnp.sin(sin_inp), jnp.cos(sin_inp)], axis=-1)
    return emb.reshape(seq_len, channels)


def pack_params(params, *, num_heads, fold, batch, seq_len):
    """One-time host-side weight repacking + algebraic fusion, hoisted out of the
    forward path (runs once at parameter-load time)."""
    f32, bf16 = jnp.float32, jnp.bfloat16
    layers = params["layers"]
    L = len(layers)
    C = params["emb_w"].shape[1]
    cf = C // fold
    hd = C // num_heads
    scale = float(hd) ** -0.5
    B, S = batch, seq_len
    M = B * S
    HM = num_heads * M
    PAD = ((C + 127) // 128) * 128       # lane-tile aligned block width for q/k/v

    # fold-mean as a matrix:  u = xn @ A,  A[f*cf + j, j] = 1/fold
    A = jnp.tile(jnp.eye(cf, dtype=f32), (fold, 1)) / float(fold)            # (C, cf)

    def pad_cols(w, width):
        return jnp.concatenate(
            [w, jnp.zeros((w.shape[0], width - w.shape[1]), w.dtype)], axis=1)

    ln1g, ln1b, weff, beff, ln2g, ln2b, wqkv, wproj, bproj = ([] for _ in range(9))
    for lp in layers:
        wcu_t, wcx_t = lp["wcomb_t"][:C], lp["wcomb_t"][C:]
        w_eff = A @ lp["wpre_t"] @ wcu_t + wcx_t                             # (C, C)
        b_eff = lp["bpre"] @ wcu_t + lp["bc"]                                # (C,)
        wq = lp["wqkv_t"][:, 0 * C:1 * C] * scale      # softmax scale folded into Wq
        wk = lp["wqkv_t"][:, 1 * C:2 * C]
        wv = lp["wqkv_t"][:, 2 * C:3 * C]
        wqkv_pad = jnp.concatenate([pad_cols(wq, PAD), pad_cols(wk, PAD),
                                    pad_cols(wv, PAD)], axis=1)              # (C, 3*PAD)
        wproj_pad = jnp.concatenate([lp["wproj_t"],
                                     jnp.zeros((PAD - C, C), f32)], axis=0)  # (PAD, C)
        ln1g.append(lp["ln1_g"].reshape(1, C)); ln1b.append(lp["ln1_b"].reshape(1, C))
        ln2g.append(lp["ln2_g"].reshape(1, C)); ln2b.append(lp["ln2_b"].reshape(1, C))
        weff.append(w_eff.astype(bf16)); beff.append(b_eff.reshape(1, C))
        wqkv.append(wqkv_pad.astype(bf16))
        wproj.append(wproj_pad.astype(bf16)); bproj.append(lp["bproj"].reshape(1, C))

    stack = lambda xs: jnp.stack(xs, axis=0)

    # precomputed attention constants (compile-time for fixed B, S, heads)
    head_of_srow = jnp.arange(HM, dtype=jnp.int32) // M       # score column / K row -> head
    chan = jnp.arange(PAD, dtype=jnp.int32)
    head_of_chan = jnp.where(chan < C, chan // hd, -1)         # padded channels -> no head
    keep = (head_of_srow[:, None] == head_of_chan[None, :]).astype(bf16)      # (HM, PAD)
    rowb = jnp.arange(M, dtype=jnp.int32) // S
    colb = (jnp.arange(HM, dtype=jnp.int32) % M) // S
    bmask = jnp.where(rowb[:, None] == colb[None, :], 0.0, -1e30).astype(f32)  # (M, HM)
    segt = (head_of_srow[:, None] ==
            jnp.arange(num_heads, dtype=jnp.int32)[None, :]).astype(f32)       # (HM, H)
    expc = (jnp.arange(num_heads, dtype=jnp.int32)[:, None] ==
            head_of_chan[None, :]).astype(f32)                                 # (H, PAD)
    lastsel = jax.nn.one_hot((jnp.arange(B) + 1) * S - 1, M, dtype=f32)        # (B, M)

    posb = positional_encoding_1d(S, C) + params["emb_b"][None, :]             # bias folded

    wheads = jnp.concatenate([params["w_" + n] for n, _ in HEAD_DIMS], axis=1).astype(bf16)
    bheads = jnp.concatenate([params["b_" + n] for n, _ in HEAD_DIMS], axis=0).reshape(1, -1)

    return {
        "num_heads": num_heads, "n_layers": L, "batch": B, "seq_len": S,
        "emb_w": params["emb_w"].astype(bf16), "posb": posb,
        "ln1g": stack(ln1g), "ln1b": stack(ln1b),
        "weff": stack(weff), "beff": stack(beff),
        "ln2g": stack(ln2g), "ln2b": stack(ln2b),
        "wqkv": stack(wqkv), "wproj": stack(wproj), "bproj": stack(bproj),
        "keep": keep, "bmask": bmask, "segt": segt, "expc": expc, "lastsel": lastsel,
        "wts": params["wts_t"].astype(bf16), "bts": params["bts"].reshape(1, -1),
        "wheads": wheads, "bheads": bheads,
    }


def model_forward(x, packed):
    """Full CustomS3AttentionModel forward (inference) as ONE fused pallas_call: the
    encoder state stays resident in VMEM/vregs across the embedding, every attention
    layer and the output heads (no per-layer launches or HBM round-trips)."""
    B, S, E = x.shape
    assert B == packed["batch"] and S == packed["seq_len"]
    kernel = functools.partial(fused_forward_kernel,
                               num_heads=packed["num_heads"],
                               n_layers=packed["n_layers"])
    ts, cat = pl.pallas_call(
        kernel,
        out_shape=(jax.ShapeDtypeStruct((B, S, E), jnp.float32),
                   jax.ShapeDtypeStruct((B, HEADS_TOTAL), jnp.float32)),
    )(x,
      packed["emb_w"], packed["posb"],
      packed["ln1g"], packed["ln1b"], packed["weff"], packed["beff"],
      packed["ln2g"], packed["ln2b"], packed["wqkv"], packed["wproj"], packed["bproj"],
      packed["keep"], packed["bmask"], packed["segt"], packed["expc"], packed["lastsel"],
      packed["wts"], packed["bts"], packed["wheads"], packed["bheads"])
    outs = [ts]
    off = 0
    for _, d in HEAD_DIMS:
        outs.append(cat[:, off:off + d])
        off += d
    return tuple(outs)
    # TODO(synk): x_mark_enc, dp_rank, output_attention, pred_len do not affect the
    # reference forward and are not modeled.


# ----------------------------------------------------------------------------------
# Pure-JAX reference (mirrors the PyTorch forward, all f32)
# ----------------------------------------------------------------------------------
def _ln_ref(z, g, b, eps=1e-5):
    mu = z.mean(-1, keepdims=True)
    var = ((z - mu) ** 2).mean(-1, keepdims=True)
    return (z - mu) / jnp.sqrt(var + eps) * g + b


def _attention_ref(x, lp, *, num_heads, fold):
    B, N, C = x.shape
    xn = _ln_ref(x, lp["ln1_g"], lp["ln1_b"])
    u = xn.reshape(B, N, fold, C // fold).mean(axis=2)
    u = u @ lp["wpre_t"] + lp["bpre"]
    h = jnp.concatenate([u, xn], axis=-1) @ lp["wcomb_t"] + lp["bc"]
    h = _ln_ref(h, lp["ln2_g"], lp["ln2_b"])
    qkv = (h @ lp["wqkv_t"]).reshape(B, N, 3, num_heads, C // num_heads)
    qkv = qkv.transpose(2, 0, 3, 1, 4)
    q, k, v = qkv[0], qkv[1], qkv[2]
    scale = (C // num_heads) ** -0.5
    attn = jax.nn.softmax(jnp.einsum("bhnd,bhmd->bhnm", q, k) * scale, axis=-1)
    ctx = jnp.einsum("bhnm,bhmd->bhnd", attn, v).transpose(0, 2, 1, 3).reshape(B, N, C)
    return ctx @ lp["wproj_t"] + lp["bproj"]


def reference_forward(x, params, *, num_heads, fold):
    B, S, E = x.shape
    D = params["emb_w"].shape[1]
    x1 = x @ params["emb_w"] + params["emb_b"]
    enc = x1 + positional_encoding_1d(S, D)[None]
    for lp in params["layers"]:
        enc = _attention_ref(enc, lp, num_heads=num_heads, fold=fold) + enc
    outs = [enc @ params["wts_t"] + params["bts"]]
    last = enc[:, -1, :]
    for name, _ in HEAD_DIMS:
        outs.append(last @ params["w_" + name] + params["b_" + name])
    return tuple(outs)


# ----------------------------------------------------------------------------------
# Parameters
# ----------------------------------------------------------------------------------
def make_params(key, *, enc_in, d_model, e_layers, fold=8):
    std = 0.02
    cf = d_model // fold
    keys = iter(jax.random.split(key, 64))
    nrm = lambda shape: std * jax.random.normal(next(keys), shape, jnp.float32)

    layers = []
    for _ in range(e_layers):
        layers.append({
            "ln1_g": jnp.ones((d_model,), jnp.float32),
            "ln1_b": jnp.zeros((d_model,), jnp.float32),
            "wpre_t": nrm((cf, d_model)),             # pre_proj: Linear(C//fold -> C), (in, out)
            "bpre": nrm((d_model,)),
            "wcomb_t": nrm((2 * d_model, d_model)),   # combine_proj: Linear(2C -> C), (in, out)
            "bc": nrm((d_model,)),
            "ln2_g": jnp.ones((d_model,), jnp.float32),
            "ln2_b": jnp.zeros((d_model,), jnp.float32),
            "wqkv_t": nrm((d_model, 3 * d_model)),    # qkv: Linear(C -> 3C), qkv_bias=False
            "wproj_t": nrm((d_model, d_model)),
            "bproj": nrm((d_model,)),
        })

    params = {
        "emb_w": nrm((enc_in, d_model)),              # Conv1d(enc_in, d_model, k=1) as a matmul
        "emb_b": nrm((d_model,)),
        "layers": layers,
        "wts_t": nrm((d_model, enc_in)),              # final time-series projection
        "bts": nrm((enc_in,)),
    }
    for name, dim in HEAD_DIMS:
        params["w_" + name] = nrm((d_model, dim))
        params["b_" + name] = nrm((dim,))
    return params


if __name__ == "__main__":
    # Small shapes consistent with the module: d_model % n_heads == 0, d_model % fold == 0.
    B, S, E, D = 2, 8, 4, 32            # batch, seq_len, enc_in, d_model
    num_heads, fold, e_layers = 8, 8, 2

    key = jax.random.PRNGKey(0)
    kx, kp = jax.random.split(key)
    x = jax.random.normal(kx, (B, S, E), jnp.float32)
    params = make_params(kp, enc_in=E, d_model=D, e_layers=e_layers, fold=fold)

    # one-time weight packing, hoisted out of the forward path
    packed = pack_params(params, num_heads=num_heads, fold=fold, batch=B, seq_len=S)

    outs = model_forward(x, packed)
    outs = jax.block_until_ready(outs)

    refs = reference_forward(x, params, num_heads=num_heads, fold=fold)
    names = ("time_series_pred",) + tuple(n for n, _ in HEAD_DIMS)
    for name, o, r in zip(names, outs, refs):
        assert o.shape == r.shape, (name, o.shape, r.shape)
        err = float(jnp.max(jnp.abs(o - r)))
        assert jnp.allclose(o, r, atol=1e-2, rtol=1e-2), (name, err)

    print("KERNEL_OK")
</pallas_src>

<mosaic_0001>
module attributes {stable_mosaic.version = 11 : i64} {
  func.func @fused_forward_kernel(%arg0: memref<2x8x4xf32, #tpu.memory_space<vmem>>, %arg1: memref<4x32xbf16, #tpu.memory_space<vmem>>, %arg2: memref<8x32xf32, #tpu.memory_space<vmem>>, %arg3: memref<2x1x32xf32, #tpu.memory_space<vmem>>, %arg4: memref<2x1x32xf32, #tpu.memory_space<vmem>>, %arg5: memref<2x32x32xbf16, #tpu.memory_space<vmem>>, %arg6: memref<2x1x32xf32, #tpu.memory_space<vmem>>, %arg7: memref<2x1x32xf32, #tpu.memory_space<vmem>>, %arg8: memref<2x1x32xf32, #tpu.memory_space<vmem>>, %arg9: memref<2x32x384xbf16, #tpu.memory_space<vmem>>, %arg10: memref<2x128x32xbf16, #tpu.memory_space<vmem>>, %arg11: memref<2x1x32xf32, #tpu.memory_space<vmem>>, %arg12: memref<128x128xbf16, #tpu.memory_space<vmem>>, %arg13: memref<16x128xf32, #tpu.memory_space<vmem>>, %arg14: memref<128x8xf32, #tpu.memory_space<vmem>>, %arg15: memref<8x128xf32, #tpu.memory_space<vmem>>, %arg16: memref<2x16xf32, #tpu.memory_space<vmem>>, %arg17: memref<32x4xbf16, #tpu.memory_space<vmem>>, %arg18: memref<1x4xf32, #tpu.memory_space<vmem>>, %arg19: memref<32x43xbf16, #tpu.memory_space<vmem>>, %arg20: memref<1x43xf32, #tpu.memory_space<vmem>>, %arg21: memref<2x8x4xf32, #tpu.memory_space<vmem>>, %arg22: memref<2x43xf32, #tpu.memory_space<vmem>>) attributes {dimension_semantics = [], scalar_prefetch = 0 : i64, scratch_operands = 0 : i64, tpu.core_type = #tpu.core_type<tc>} {
    %c0 = arith.constant 0 : index
    %c0_0 = arith.constant 0 : index
    %c0_1 = arith.constant 0 : index
    %0 = vector.load %arg0[%c0, %c0_0, %c0_1] : memref<2x8x4xf32, #tpu.memory_space<vmem>>, vector<2x8x4xf32>
    %1 = vector.shape_cast %0 : vector<2x8x4xf32> to vector<16x4xf32>
    %2 = arith.truncf %1 : vector<16x4xf32> to vector<16x4xbf16>
    %c0_2 = arith.constant 0 : index
    %c0_3 = arith.constant 0 : index
    %3 = vector.load %arg2[%c0_2, %c0_3] : memref<8x32xf32, #tpu.memory_space<vmem>>, vector<8x32xf32>
    %4 = tpu.concatenate %3, %3 in 0 : vector<8x32xf32>, vector<8x32xf32> -> vector<16x32xf32>
    %c0_4 = arith.constant 0 : index
    %c0_5 = arith.constant 0 : index
    %5 = vector.load %arg1[%c0_4, %c0_5] : memref<4x32xbf16, #tpu.memory_space<vmem>>, vector<4x32xbf16>
    %cst = arith.constant dense<0.000000e+00> : vector<16x32xf32>
    %6 = tpu.matmul %2, %5, %cst {dimension_numbers = #tpu.dot_dimension_numbers<[1], [0], [0], [1], [0, 0, 1, 1], [], []>} : vector<16x4xbf16>, vector<4x32xbf16>, vector<16x32xf32> -> vector<16x32xf32>
    %7 = arith.addf %6, %4 : vector<16x32xf32>
    %c0_6 = arith.constant 0 : index
    %c0_7 = arith.constant 0 : index
    %8 = vector.load %arg12[%c0_6, %c0_7] : memref<128x128xbf16, #tpu.memory_space<vmem>>, vector<128x128xbf16>
    %c0_8 = arith.constant 0 : index
    %c0_9 = arith.constant 0 : index
    %9 = vector.load %arg13[%c0_8, %c0_9] : memref<16x128xf32, #tpu.memory_space<vmem>>, vector<16x128xf32>
    %c0_10 = arith.constant 0 : index
    %c0_11 = arith.constant 0 : index
    %10 = vector.load %arg14[%c0_10, %c0_11] : memref<128x8xf32, #tpu.memory_space<vmem>>, vector<128x8xf32>
    %c0_12 = arith.constant 0 : index
    %c0_13 = arith.constant 0 : index
    %11 = vector.load %arg15[%c0_12, %c0_13] : memref<8x128xf32, #tpu.memory_space<vmem>>, vector<8x128xf32>
    %c0_14 = arith.constant 0 : index
    %c0_15 = arith.constant 0 : index
    %c0_16 = arith.constant 0 : index
    %12 = vector.load %arg3[%c0_14, %c0_15, %c0_16] : memref<2x1x32xf32, #tpu.memory_space<vmem>>, vector<1x1x32xf32>
    %13 = vector.shape_cast %12 : vector<1x1x32xf32> to vector<1x32xf32>
    %c0_17 = arith.constant 0 : index
    %c0_18 = arith.constant 0 : index
    %c0_19 = arith.constant 0 : index
    %14 = vector.load %arg4[%c0_17, %c0_18, %c0_19] : memref<2x1x32xf32, #tpu.memory_space<vmem>>, vector<1x1x32xf32>
    %15 = vector.shape_cast %14 : vector<1x1x32xf32> to vector<1x32xf32>
    %cst_20 = arith.constant dense<0.000000e+00> : vector<16xf32>
    %16 = vector.multi_reduction <add>, %7, %cst_20 [1] : vector<16x32xf32> to vector<16xf32>
    %17 = vector.shape_cast %16 : vector<16xf32> to vector<16x1xf32>
    %cst_21 = arith.constant 3.200000e+01 : f32
    %18 = vector.broadcast %cst_21 : f32 to vector<16x1xf32>
    %19 = arith.divf %17, %18 : vector<16x1xf32>
    %20 = arith.mulf %7, %7 : vector<16x32xf32>
    %cst_22 = arith.constant dense<0.000000e+00> : vector<16xf32>
    %21 = vector.multi_reduction <add>, %20, %cst_22 [1] : vector<16x32xf32> to vector<16xf32>
    %22 = vector.shape_cast %21 : vector<16xf32> to vector<16x1xf32>
    %cst_23 = arith.constant 3.200000e+01 : f32
    %23 = vector.broadcast %cst_23 : f32 to vector<16x1xf32>
    %24 = arith.divf %22, %23 : vector<16x1xf32>
    %25 = arith.mulf %19, %19 : vector<16x1xf32>
    %26 = arith.subf %24, %25 : vector<16x1xf32>
    %cst_24 = arith.constant 9.99999974E-6 : f32
    %27 = vector.broadcast %cst_24 : f32 to vector<16x1xf32>
    %28 = arith.addf %26, %27 : vector<16x1xf32>
    %29 = math.rsqrt %28 : vector<16x1xf32>
    %30 = vector.broadcast %19 : vector<16x1xf32> to vector<16x32xf32>
    %31 = arith.subf %7, %30 : vector<16x32xf32>
    %32 = vector.broadcast %29 : vector<16x1xf32> to vector<16x32xf32>
    %33 = arith.mulf %31, %32 : vector<16x32xf32>
    %34 = vector.broadcast %13 : vector<1x32xf32> to vector<16x32xf32>
    %35 = arith.mulf %33, %34 : vector<16x32xf32>
    %36 = vector.broadcast %15 : vector<1x32xf32> to vector<16x32xf32>
    %37 = arith.addf %35, %36 : vector<16x32xf32>
    %38 = arith.truncf %37 : vector<16x32xf32> to vector<16x32xbf16>
    %c0_25 = arith.constant 0 : index
    %c0_26 = arith.constant 0 : index
    %c0_27 = arith.constant 0 : index
    %39 = vector.load %arg5[%c0_25, %c0_26, %c0_27] : memref<2x32x32xbf16, #tpu.memory_space<vmem>>, vector<1x32x32xbf16>
    %40 = vector.shape_cast %39 : vector<1x32x32xbf16> to vector<32x32xbf16>
    %cst_28 = arith.constant dense<0.000000e+00> : vector<16x32xf32>
    %41 = tpu.matmul %38, %40, %cst_28 {dimension_numbers = #tpu.dot_dimension_numbers<[1], [0], [0], [1], [0, 0, 1, 1], [], []>} : vector<16x32xbf16>, vector<32x32xbf16>, vector<16x32xf32> -> vector<16x32xf32>
    %c0_29 = arith.constant 0 : index
    %c0_30 = arith.constant 0 : index
    %c0_31 = arith.constant 0 : index
    %42 = vector.load %arg6[%c0_29, %c0_30, %c0_31] : memref<2x1x32xf32, #tpu.memory_space<vmem>>, vector<1x1x32xf32>
    %43 = vector.shape_cast %42 : vector<1x1x32xf32> to vector<1x32xf32>
    %44 = vector.broadcast %43 : vector<1x32xf32> to vector<16x32xf32>
    %45 = arith.addf %41, %44 : vector<16x32xf32>
    %c0_32 = arith.constant 0 : index
    %c0_33 = arith.constant 0 : index
    %c0_34 = arith.constant 0 : index
    %46 = vector.load %arg7[%c0_32, %c0_33, %c0_34] : memref<2x1x32xf32, #tpu.memory_space<vmem>>, vector<1x1x32xf32>
    %47 = vector.shape_cast %46 : vector<1x1x32xf32> to vector<1x32xf32>
    %c0_35 = arith.constant 0 : index
    %c0_36 = arith.constant 0 : index
    %c0_37 = arith.constant 0 : index
    %48 = vector.load %arg8[%c0_35, %c0_36, %c0_37] : memref<2x1x32xf32, #tpu.memory_space<vmem>>, vector<1x1x32xf32>
    %49 = vector.shape_cast %48 : vector<1x1x32xf32> to vector<1x32xf32>
    %cst_38 = arith.constant dense<0.000000e+00> : vector<16xf32>
    %50 = vector.multi_reduction <add>, %45, %cst_38 [1] : vector<16x32xf32> to vector<16xf32>
    %51 = vector.shape_cast %50 : vector<16xf32> to vector<16x1xf32>
    %cst_39 = arith.constant 3.200000e+01 : f32
    %52 = vector.broadcast %cst_39 : f32 to vector<16x1xf32>
    %53 = arith.divf %51, %52 : vector<16x1xf32>
    %54 = arith.mulf %45, %45 : vector<16x32xf32>
    %cst_40 = arith.constant dense<0.000000e+00> : vector<16xf32>
    %55 = vector.multi_reduction <add>, %54, %cst_40 [1] : vector<16x32xf32> to vector<16xf32>
    %56 = vector.shape_cast %55 : vector<16xf32> to vector<16x1xf32>
    %cst_41 = arith.constant 3.200000e+01 : f32
    %57 = vector.broadcast %cst_41 : f32 to vector<16x1xf32>
    %58 = arith.divf %56, %57 : vector<16x1xf32>
    %59 = arith.mulf %53, %53 : vector<16x1xf32>
    %60 = arith.subf %58, %59 : vector<16x1xf32>
    %cst_42 = arith.constant 9.99999974E-6 : f32
    %61 = vector.broadcast %cst_42 : f32 to vector<16x1xf32>
    %62 = arith.addf %60, %61 : vector<16x1xf32>
    %63 = math.rsqrt %62 : vector<16x1xf32>
    %64 = vector.broadcast %53 : vector<16x1xf32> to vector<16x32xf32>
    %65 = arith.subf %45, %64 : vector<16x32xf32>
    %66 = vector.broadcast %63 : vector<16x1xf32> to vector<16x32xf32>
    %67 = arith.mulf %65, %66 : vector<16x32xf32>
    %68 = vector.broadcast %47 : vector<1x32xf32> to vector<16x32xf32>
    %69 = arith.mulf %67, %68 : vector<16x32xf32>
    %70 = vector.broadcast %49 : vector<1x32xf32> to vector<16x32xf32>
    %71 = arith.addf %69, %70 : vector<16x32xf32>
    %72 = arith.truncf %71 : vector<16x32xf32> to vector<16x32xbf16>
    %c0_43 = arith.constant 0 : index
    %c0_44 = arith.constant 0 : index
    %c0_45 = arith.constant 0 : index
    %73 = vector.load %arg9[%c0_43, %c0_44, %c0_45] : memref<2x32x384xbf16, #tpu.memory_space<vmem>>, vector<1x32x384xbf16>
    %74 = vector.shape_cast %73 : vector<1x32x384xbf16> to vector<32x384xbf16>
    %cst_46 = arith.constant dense<0.000000e+00> : vector<16x384xf32>
    %75 = tpu.matmul %72, %74, %cst_46 {dimension_numbers = #tpu.dot_dimension_numbers<[1], [0], [0], [1], [0, 0, 1, 1], [], []>} : vector<16x32xbf16>, vector<32x384xbf16>, vector<16x384xf32> -> vector<16x384xf32>
    %76 = vector.extract_strided_slice %75 {offsets = [0, 0], sizes = [16, 128], strides = [1, 1]} : vector<16x384xf32> to vector<16x128xf32>
    %77 = arith.truncf %76 : vector<16x128xf32> to vector<16x128xbf16>
    %78 = vector.extract_strided_slice %75 {offsets = [0, 128], sizes = [16, 128], strides = [1, 1]} : vector<16x384xf32> to vector<16x128xf32>
    %79 = arith.truncf %78 : vector<16x128xf32> to vector<16x128xbf16>
    %80 = vector.extract_strided_slice %75 {offsets = [0, 256], sizes = [16, 128], strides = [1, 1]} : vector<16x384xf32> to vector<16x128xf32>
    %81 = arith.truncf %80 : vector<16x128xf32> to vector<16x128xbf16>
    %82 = tpu.concatenate %79, %79, %79, %79, %79, %79, %79, %79 in 0 : vector<16x128xbf16>, vector<16x128xbf16>, vector<16x128xbf16>, vector<16x128xbf16>, vector<16x128xbf16>, vector<16x128xbf16>, vector<16x128xbf16>, vector<16x128xbf16> -> vector<128x128xbf16>
    %83 = arith.mulf %82, %8 : vector<128x128xbf16>
    %84 = tpu.concatenate %81, %81, %81, %81, %81, %81, %81, %81 in 0 : vector<16x128xbf16>, vector<16x128xbf16>, vector<16x128xbf16>, vector<16x128xbf16>, vector<16x128xbf16>, vector<16x128xbf16>, vector<16x128xbf16>, vector<16x128xbf16> -> vector<128x128xbf16>
    %85 = arith.mulf %84, %8 : vector<128x128xbf16>
    %cst_47 = arith.constant dense<0.000000e+00> : vector<16x128xf32>
    %86 = tpu.matmul %77, %83, %cst_47 {dimension_numbers = #tpu.dot_dimension_numbers<[1], [1], [0], [0], [0, 0, 1, 0], [], []>} : vector<16x128xbf16>, vector<128x128xbf16>, vector<16x128xf32> -> vector<16x128xf32>
    %87 = arith.addf %86, %9 : vector<16x128xf32>
    %cst_48 = arith.constant dense<0xFF800000> : vector<16xf32>
    %88 = vector.multi_reduction <maximumf>, %87, %cst_48 [1] : vector<16x128xf32> to vector<16xf32>
    %89 = vector.shape_cast %88 : vector<16xf32> to vector<16x1xf32>
    %90 = vector.broadcast %89 : vector<16x1xf32> to vector<16x128xf32>
    %91 = arith.subf %87, %90 : vector<16x128xf32>
    %92 = math.exp %91 : vector<16x128xf32>
    %cst_49 = arith.constant dense<0.000000e+00> : vector<16x8xf32>
    %93 = tpu.matmul %92, %10, %cst_49 {dimension_numbers = #tpu.dot_dimension_numbers<[1], [0], [0], [1], [0, 0, 1, 1], [], []>} : vector<16x128xf32>, vector<128x8xf32>, vector<16x8xf32> -> vector<16x8xf32>
    %94 = tpu.reciprocal %93 {approx = true} : vector<16x8xf32> -> vector<16x8xf32>
    %95 = arith.truncf %92 : vector<16x128xf32> to vector<16x128xbf16>
    %cst_50 = arith.constant dense<0.000000e+00> : vector<16x128xf32>
    %96 = tpu.matmul %95, %85, %cst_50 {dimension_numbers = #tpu.dot_dimension_numbers<[1], [0], [0], [1], [0, 0, 1, 1], [], []>} : vector<16x128xbf16>, vector<128x128xbf16>, vector<16x128xf32> -> vector<16x128xf32>
    %cst_51 = arith.constant dense<0.000000e+00> : vector<16x128xf32>
    %97 = tpu.matmul %94, %11, %cst_51 {dimension_numbers = #tpu.dot_dimension_numbers<[1], [0], [0], [1], [0, 0, 1, 1], [], []>} : vector<16x8xf32>, vector<8x128xf32>, vector<16x128xf32> -> vector<16x128xf32>
    %98 = arith.mulf %96, %97 : vector<16x128xf32>
    %99 = arith.truncf %98 : vector<16x128xf32> to vector<16x128xbf16>
    %c0_52 = arith.constant 0 : index
    %c0_53 = arith.constant 0 : index
    %c0_54 = arith.constant 0 : index
    %100 = vector.load %arg10[%c0_52, %c0_53, %c0_54] : memref<2x128x32xbf16, #tpu.memory_space<vmem>>, vector<1x128x32xbf16>
    %101 = vector.shape_cast %100 : vector<1x128x32xbf16> to vector<128x32xbf16>
    %cst_55 = arith.constant dense<0.000000e+00> : vector<16x32xf32>
    %102 = tpu.matmul %99, %101, %cst_55 {dimension_numbers = #tpu.dot_dimension_numbers<[1], [0], [0], [1], [0, 0, 1, 1], [], []>} : vector<16x128xbf16>, vector<128x32xbf16>, vector<16x32xf32> -> vector<16x32xf32>
    %c0_56 = arith.constant 0 : index
    %c0_57 = arith.constant 0 : index
    %c0_58 = arith.constant 0 : index
    %103 = vector.load %arg11[%c0_56, %c0_57, %c0_58] : memref<2x1x32xf32, #tpu.memory_space<vmem>>, vector<1x1x32xf32>
    %104 = vector.shape_cast %103 : vector<1x1x32xf32> to vector<1x32xf32>
    %105 = vector.broadcast %104 : vector<1x32xf32> to vector<16x32xf32>
    %106 = arith.addf %102, %105 : vector<16x32xf32>
    %107 = arith.addf %7, %106 : vector<16x32xf32>
    %c1 = arith.constant 1 : index
    %c0_59 = arith.constant 0 : index
    %c0_60 = arith.constant 0 : index
    %108 = vector.load %arg3[%c1, %c0_59, %c0_60] : memref<2x1x32xf32, #tpu.memory_space<vmem>>, vector<1x1x32xf32>
    %109 = vector.shape_cast %108 : vector<1x1x32xf32> to vector<1x32xf32>
    %c1_61 = arith.constant 1 : index
    %c0_62 = arith.constant 0 : index
    %c0_63 = arith.constant 0 : index
    %110 = vector.load %arg4[%c1_61, %c0_62, %c0_63] : memref<2x1x32xf32, #tpu.memory_space<vmem>>, vector<1x1x32xf32>
    %111 = vector.shape_cast %110 : vector<1x1x32xf32> to vector<1x32xf32>
    %cst_64 = arith.constant dense<0.000000e+00> : vector<16xf32>
    %112 = vector.multi_reduction <add>, %107, %cst_64 [1] : vector<16x32xf32> to vector<16xf32>
    %113 = vector.shape_cast %112 : vector<16xf32> to vector<16x1xf32>
    %cst_65 = arith.constant 3.200000e+01 : f32
    %114 = vector.broadcast %cst_65 : f32 to vector<16x1xf32>
    %115 = arith.divf %113, %114 : vector<16x1xf32>
    %116 = arith.mulf %107, %107 : vector<16x32xf32>
    %cst_66 = arith.constant dense<0.000000e+00> : vector<16xf32>
    %117 = vector.multi_reduction <add>, %116, %cst_66 [1] : vector<16x32xf32> to vector<16xf32>
    %118 = vector.shape_cast %117 : vector<16xf32> to vector<16x1xf32>
    %cst_67 = arith.constant 3.200000e+01 : f32
    %119 = vector.broadcast %cst_67 : f32 to vector<16x1xf32>
    %120 = arith.divf %118, %119 : vector<16x1xf32>
    %121 = arith.mulf %115, %115 : vector<16x1xf32>
    %122 = arith.subf %120, %121 : vector<16x1xf32>
    %cst_68 = arith.constant 9.99999974E-6 : f32
    %123 = vector.broadcast %cst_68 : f32 to vector<16x1xf32>
    %124 = arith.addf %122, %123 : vector<16x1xf32>
    %125 = math.rsqrt %124 : vector<16x1xf32>
    %126 = vector.broadcast %115 : vector<16x1xf32> to vector<16x32xf32>
    %127 = arith.subf %107, %126 : vector<16x32xf32>
    %128 = vector.broadcast %125 : vector<16x1xf32> to vector<16x32xf32>
    %129 = arith.mulf %127, %128 : vector<16x32xf32>
    %130 = vector.broadcast %109 : vector<1x32xf32> to vector<16x32xf32>
    %131 = arith.mulf %129, %130 : vector<16x32xf32>
    %132 = vector.broadcast %111 : vector<1x32xf32> to vector<16x32xf32>
    %133 = arith.addf %131, %132 : vector<16x32xf32>
    %134 = arith.truncf %133 : vector<16x32xf32> to vector<16x32xbf16>
    %c1_69 = arith.constant 1 : index
    %c0_70 = arith.constant 0 : index
    %c0_71 = arith.constant 0 : index
    %135 = vector.load %arg5[%c1_69, %c0_70, %c0_71] : memref<2x32x32xbf16, #tpu.memory_space<vmem>>, vector<1x32x32xbf16>
    %136 = vector.shape_cast %135 : vector<1x32x32xbf16> to vector<32x32xbf16>
    %cst_72 = arith.constant dense<0.000000e+00> : vector<16x32xf32>
    %137 = tpu.matmul %134, %136, %cst_72 {dimension_numbers = #tpu.dot_dimension_numbers<[1], [0], [0], [1], [0, 0, 1, 1], [], []>} : vector<16x32xbf16>, vector<32x32xbf16>, vector<16x32xf32> -> vector<16x32xf32>
    %c1_73 = arith.constant 1 : index
    %c0_74 = arith.constant 0 : index
    %c0_75 = arith.constant 0 : index
    %138 = vector.load %arg6[%c1_73, %c0_74, %c0_75] : memref<2x1x32xf32, #tpu.memory_space<vmem>>, vector<1x1x32xf32>
    %139 = vector.shape_cast %138 : vector<1x1x32xf32> to vector<1x32xf32>
    %140 = vector.broadcast %139 : vector<1x32xf32> to vector<16x32xf32>
    %141 = arith.addf %137, %140 : vector<16x32xf32>
    %c1_76 = arith.constant 1 : index
    %c0_77 = arith.constant 0 : index
    %c0_78 = arith.constant 0 : index
    %142 = vector.load %arg7[%c1_76, %c0_77, %c0_78] : memref<2x1x32xf32, #tpu.memory_space<vmem>>, vector<1x1x32xf32>
    %143 = vector.shape_cast %142 : vector<1x1x32xf32> to vector<1x32xf32>
    %c1_79 = arith.constant 1 : index
    %c0_80 = arith.constant 0 : index
    %c0_81 = arith.constant 0 : index
    %144 = vector.load %arg8[%c1_79, %c0_80, %c0_81] : memref<2x1x32xf32, #tpu.memory_space<vmem>>, vector<1x1x32xf32>
    %145 = vector.shape_cast %144 : vector<1x1x32xf32> to vector<1x32xf32>
    %cst_82 = arith.constant dense<0.000000e+00> : vector<16xf32>
    %146 = vector.multi_reduction <add>, %141, %cst_82 [1] : vector<16x32xf32> to vector<16xf32>
    %147 = vector.shape_cast %146 : vector<16xf32> to vector<16x1xf32>
    %cst_83 = arith.constant 3.200000e+01 : f32
    %148 = vector.broadcast %cst_83 : f32 to vector<16x1xf32>
    %149 = arith.divf %147, %148 : vector<16x1xf32>
    %150 = arith.mulf %141, %141 : vector<16x32xf32>
    %cst_84 = arith.constant dense<0.000000e+00> : vector<16xf32>
    %151 = vector.multi_reduction <add>, %150, %cst_84 [1] : vector<16x32xf32> to vector<16xf32>
    %152 = vector.shape_cast %151 : vector<16xf32> to vector<16x1xf32>
    %cst_85 = arith.constant 3.200000e+01 : f32
    %153 = vector.broadcast %cst_85 : f32 to vector<16x1xf32>
    %154 = arith.divf %152, %153 : vector<16x1xf32>
    %155 = arith.mulf %149, %149 : vector<16x1xf32>
    %156 = arith.subf %154, %155 : vector<16x1xf32>
    %cst_86 = arith.constant 9.99999974E-6 : f32
    %157 = vector.broadcast %cst_86 : f32 to vector<16x1xf32>
    %158 = arith.addf %156, %157 : vector<16x1xf32>
    %159 = math.rsqrt %158 : vector<16x1xf32>
    %160 = vector.broadcast %149 : vector<16x1xf32> to vector<16x32xf32>
    %161 = arith.subf %141, %160 : vector<16x32xf32>
    %162 = vector.broadcast %159 : vector<16x1xf32> to vector<16x32xf32>
    %163 = arith.mulf %161, %162 : vector<16x32xf32>
    %164 = vector.broadcast %143 : vector<1x32xf32> to vector<16x32xf32>
    %165 = arith.mulf %163, %164 : vector<16x32xf32>
    %166 = vector.broadcast %145 : vector<1x32xf32> to vector<16x32xf32>
    %167 = arith.addf %165, %166 : vector<16x32xf32>
    %168 = arith.truncf %167 : vector<16x32xf32> to vector<16x32xbf16>
    %c1_87 = arith.constant 1 : index
    %c0_88 = arith.constant 0 : index
    %c0_89 = arith.constant 0 : index
    %169 = vector.load %arg9[%c1_87, %c0_88, %c0_89] : memref<2x32x384xbf16, #tpu.memory_space<vmem>>, vector<1x32x384xbf16>
    %170 = vector.shape_cast %169 : vector<1x32x384xbf16> to vector<32x384xbf16>
    %cst_90 = arith.constant dense<0.000000e+00> : vector<16x384xf32>
    %171 = tpu.matmul %168, %170, %cst_90 {dimension_numbers = #tpu.dot_dimension_numbers<[1], [0], [0], [1], [0, 0, 1, 1], [], []>} : vector<16x32xbf16>, vector<32x384xbf16>, vector<16x384xf32> -> vector<16x384xf32>
    %172 = vector.extract_strided_slice %171 {offsets = [0, 0], sizes = [16, 128], strides = [1, 1]} : vector<16x384xf32> to vector<16x128xf32>
    %173 = arith.truncf %172 : vector<16x128xf32> to vector<16x128xbf16>
    %174 = vector.extract_strided_slice %171 {offsets = [0, 128], sizes = [16, 128], strides = [1, 1]} : vector<16x384xf32> to vector<16x128xf32>
    %175 = arith.truncf %174 : vector<16x128xf32> to vector<16x128xbf16>
    %176 = vector.extract_strided_slice %171 {offsets = [0, 256], sizes = [16, 128], strides = [1, 1]} : vector<16x384xf32> to vector<16x128xf32>
    %177 = arith.truncf %176 : vector<16x128xf32> to vector<16x128xbf16>
    %178 = tpu.concatenate %175, %175, %175, %175, %175, %175, %175, %175 in 0 : vector<16x128xbf16>, vector<16x128xbf16>, vector<16x128xbf16>, vector<16x128xbf16>, vector<16x128xbf16>, vector<16x128xbf16>, vector<16x128xbf16>, vector<16x128xbf16> -> vector<128x128xbf16>
    %179 = arith.mulf %178, %8 : vector<128x128xbf16>
    %180 = tpu.concatenate %177, %177, %177, %177, %177, %177, %177, %177 in 0 : vector<16x128xbf16>, vector<16x128xbf16>, vector<16x128xbf16>, vector<16x128xbf16>, vector<16x128xbf16>, vector<16x128xbf16>, vector<16x128xbf16>, vector<16x128xbf16> -> vector<128x128xbf16>
    %181 = arith.mulf %180, %8 : vector<128x128xbf16>
    %cst_91 = arith.constant dense<0.000000e+00> : vector<16x128xf32>
    %182 = tpu.matmul %173, %179, %cst_91 {dimension_numbers = #tpu.dot_dimension_numbers<[1], [1], [0], [0], [0, 0, 1, 0], [], []>} : vector<16x128xbf16>, vector<128x128xbf16>, vector<16x128xf32> -> vector<16x128xf32>
    %183 = arith.addf %182, %9 : vector<16x128xf32>
    %cst_92 = arith.constant dense<0xFF800000> : vector<16xf32>
    %184 = vector.multi_reduction <maximumf>, %183, %cst_92 [1] : vector<16x128xf32> to vector<16xf32>
    %185 = vector.shape_cast %184 : vector<16xf32> to vector<16x1xf32>
    %186 = vector.broadcast %185 : vector<16x1xf32> to vector<16x128xf32>
    %187 = arith.subf %183, %186 : vector<16x128xf32>
    %188 = math.exp %187 : vector<16x128xf32>
    %cst_93 = arith.constant dense<0.000000e+00> : vector<16x8xf32>
    %189 = tpu.matmul %188, %10, %cst_93 {dimension_numbers = #tpu.dot_dimension_numbers<[1], [0], [0], [1], [0, 0, 1, 1], [], []>} : vector<16x128xf32>, vector<128x8xf32>, vector<16x8xf32> -> vector<16x8xf32>
    %190 = tpu.reciprocal %189 {approx = true} : vector<16x8xf32> -> vector<16x8xf32>
    %191 = arith.truncf %188 : vector<16x128xf32> to vector<16x128xbf16>
    %cst_94 = arith.constant dense<0.000000e+00> : vector<16x128xf32>
    %192 = tpu.matmul %191, %181, %cst_94 {dimension_numbers = #tpu.dot_dimension_numbers<[1], [0], [0], [1], [0, 0, 1, 1], [], []>} : vector<16x128xbf16>, vector<128x128xbf16>, vector<16x128xf32> -> vector<16x128xf32>
    %cst_95 = arith.constant dense<0.000000e+00> : vector<16x128xf32>
    %193 = tpu.matmul %190, %11, %cst_95 {dimension_numbers = #tpu.dot_dimension_numbers<[1], [0], [0], [1], [0, 0, 1, 1], [], []>} : vector<16x8xf32>, vector<8x128xf32>, vector<16x128xf32> -> vector<16x128xf32>
    %194 = arith.mulf %192, %193 : vector<16x128xf32>
    %195 = arith.truncf %194 : vector<16x128xf32> to vector<16x128xbf16>
    %c1_96 = arith.constant 1 : index
    %c0_97 = arith.constant 0 : index
    %c0_98 = arith.constant 0 : index
    %196 = vector.load %arg10[%c1_96, %c0_97, %c0_98] : memref<2x128x32xbf16, #tpu.memory_space<vmem>>, vector<1x128x32xbf16>
    %197 = vector.shape_cast %196 : vector<1x128x32xbf16> to vector<128x32xbf16>
    %cst_99 = arith.constant dense<0.000000e+00> : vector<16x32xf32>
    %198 = tpu.matmul %195, %197, %cst_99 {dimension_numbers = #tpu.dot_dimension_numbers<[1], [0], [0], [1], [0, 0, 1, 1], [], []>} : vector<16x128xbf16>, vector<128x32xbf16>, vector<16x32xf32> -> vector<16x32xf32>
    %c1_100 = arith.constant 1 : index
    %c0_101 = arith.constant 0 : index
    %c0_102 = arith.constant 0 : index
    %199 = vector.load %arg11[%c1_100, %c0_101, %c0_102] : memref<2x1x32xf32, #tpu.memory_space<vmem>>, vector<1x1x32xf32>
    %200 = vector.shape_cast %199 : vector<1x1x32xf32> to vector<1x32xf32>
    %201 = vector.broadcast %200 : vector<1x32xf32> to vector<16x32xf32>
    %202 = arith.addf %198, %201 : vector<16x32xf32>
    %203 = arith.addf %107, %202 : vector<16x32xf32>
    %204 = arith.truncf %203 : vector<16x32xf32> to vector<16x32xbf16>
    %c0_103 = arith.constant 0 : index
    %c0_104 = arith.constant 0 : index
    %205 = vector.load %arg17[%c0_103, %c0_104] : memref<32x4xbf16, #tpu.memory_space<vmem>>, vector<32x4xbf16>
    %cst_105 = arith.constant dense<0.000000e+00> : vector<16x4xf32>
    %206 = tpu.matmul %204, %205, %cst_105 {dimension_numbers = #tpu.dot_dimension_numbers<[1], [0], [0], [1], [0, 0, 1, 1], [], []>} : vector<16x32xbf16>, vector<32x4xbf16>, vector<16x4xf32> -> vector<16x4xf32>
    %c0_106 = arith.constant 0 : index
    %c0_107 = arith.constant 0 : index
    %207 = vector.load %arg18[%c0_106, %c0_107] : memref<1x4xf32, #tpu.memory_space<vmem>>, vector<1x4xf32>
    %208 = vector.broadcast %207 : vector<1x4xf32> to vector<16x4xf32>
    %209 = arith.addf %206, %208 : vector<16x4xf32>
    %210 = vector.shape_cast %209 : vector<16x4xf32> to vector<2x8x4xf32>
    %c0_108 = arith.constant 0 : index
    %c0_109 = arith.constant 0 : index
    %c0_110 = arith.constant 0 : index
    %211 = vector.load %arg21[%c0_108, %c0_109, %c0_110] : memref<2x8x4xf32, #tpu.memory_space<vmem>>, vector<2x8x4xf32>
    tpu.vector_store %arg21[%c0_108, %c0_109, %c0_110], %210 {strides = array<i32>} : memref<2x8x4xf32, #tpu.memory_space<vmem>>, vector<2x8x4xf32>,
    %c0_111 = arith.constant 0 : index
    %c0_112 = arith.constant 0 : index
    %212 = vector.load %arg16[%c0_111, %c0_112] : memref<2x16xf32, #tpu.memory_space<vmem>>, vector<2x16xf32>
    %cst_113 = arith.constant dense<0.000000e+00> : vector<2x32xf32>
    %213 = tpu.matmul %212, %203, %cst_113 {dimension_numbers = #tpu.dot_dimension_numbers<[1], [0], [0], [1], [0, 0, 1, 1], [], []>} : vector<2x16xf32>, vector<16x32xf32>, vector<2x32xf32> -> vector<2x32xf32>
    %214 = arith.truncf %213 : vector<2x32xf32> to vector<2x32xbf16>
    %c0_114 = arith.constant 0 : index
    %c0_115 = arith.constant 0 : index
    %215 = vector.load %arg19[%c0_114, %c0_115] : memref<32x43xbf16, #tpu.memory_space<vmem>>, vector<32x43xbf16>
    %cst_116 = arith.constant dense<0.000000e+00> : vector<2x43xf32>
    %216 = tpu.matmul %214, %215, %cst_116 {dimension_numbers = #tpu.dot_dimension_numbers<[1], [0], [0], [1], [0, 0, 1, 1], [], []>} : vector<2x32xbf16>, vector<32x43xbf16>, vector<2x43xf32> -> vector<2x43xf32>
    %c0_117 = arith.constant 0 : index
    %c0_118 = arith.constant 0 : index
    %217 = vector.load %arg20[%c0_117, %c0_118] : memref<1x43xf32, #tpu.memory_space<vmem>>, vector<1x43xf32>
    %218 = vector.broadcast %217 : vector<1x43xf32> to vector<2x43xf32>
    %219 = arith.addf %216, %218 : vector<2x43xf32>
    %c0_119 = arith.constant 0 : index
    %c0_120 = arith.constant 0 : index
    %220 = vector.load %arg22[%c0_119, %c0_120] : memref<2x43xf32, #tpu.memory_space<vmem>>, vector<2x43xf32>
    tpu.vector_store %arg22[%c0_119, %c0_120], %219 {strides = array<i32>} : memref<2x43xf32, #tpu.memory_space<vmem>>, vector<2x43xf32>,
    return
  }
}

</mosaic_0001>

<bundles_post_ra>
// kernel: tpu_custom_call.1
= control target key start
LH: loop header
LB: loop body
LE: loop exit
PB: predicated region body
PF: predicated region fallthrough
CT: control target
= control target key end

     0   :  { %s2311_s0 = inlined_call_operand.vmem [shape: f32[2,8,4], index: 0, kind: input, shape index: {}]   ;;  %s2312_s1 = inlined_call_operand.vmem [shape: bf16[4,32], index: 1, kind: input, shape index: {}]   ;;  %s2313_s2 = inlined_call_operand.vmem [shape: f32[8,32], index: 2, kind: input, shape index: {}]   ;;  %s2314_s3 = inlined_call_operand.vmem [shape: f32[2,1,32], index: 3, kind: input, shape index: {}]   ;;  %s2315_s4 = inlined_call_operand.vmem [shape: f32[2,1,32], index: 4, kind: input, shape index: {}]   ;;  %s2316_s5 = inlined_call_operand.vmem [shape: bf16[2,32,32], index: 5, kind: input, shape index: {}]   ;;  %s2317_s6 = inlined_call_operand.vmem [shape: f32[2,1,32], index: 6, kind: input, shape index: {}]   ;;  %s2318_s7 = inlined_call_operand.vmem [shape: f32[2,1,32], index: 7, kind: input, shape index: {}]   ;;  %s2319_s8 = inlined_call_operand.vmem [shape: f32[2,1,32], index: 8, kind: input, shape index: {}]   ;;  %s2320_s9 = inlined_call_operand.vmem [shape: bf16[2,32,384], index: 9, kind: input, shape index: {}]   ;;  %s2321_s10 = inlined_call_operand.vmem [shape: bf16[2,128,32], index: 10, kind: input, shape index: {}]   ;;  %s2322_s11 = inlined_call_operand.vmem [shape: f32[2,1,32], index: 11, kind: input, shape index: {}]   ;;  %s2323_s12 = inlined_call_operand.vmem [shape: bf16[128,128], index: 12, kind: input, shape index: {}]   ;;  %s2324_s13 = inlined_call_operand.vmem [shape: f32[16,128], index: 13, kind: input, shape index: {}]   ;;  %s2325_s14 = inlined_call_operand.vmem [shape: f32[128,8], index: 14, kind: input, shape index: {}]   ;;  %s2326_s15 = inlined_call_operand.vmem [shape: f32[8,128], index: 15, kind: input, shape index: {}]   ;;  %s2327_s16 = inlined_call_operand.vmem [shape: f32[2,16], index: 16, kind: input, shape index: {}]   ;;  %s2328_s17 = inlined_call_operand.vmem [shape: bf16[32,4], index: 17, kind: input, shape index: {}]   ;;  %s2329_s18 = inlined_call_operand.vmem [shape: f32[1,4], index: 18, kind: input, shape index: {}]   ;;  %s2330_s19 = inlined_call_operand.vmem [shape: bf16[32,43], index: 19, kind: input, shape index: {}]   ;;  %s2331_s20 = inlined_call_operand.vmem [shape: f32[1,43], index: 20, kind: input, shape index: {}]   ;;  %s2332_s21 = inlined_call_operand.vmem [shape: f32[2,8,4], index: 21, kind: output, shape index: {0}]   ;;  %s2333_s22 = inlined_call_operand.hbm [shape: f32[2,43], index: 22, kind: output, shape index: {1}]  }
   0x1   :  { %2339 = sst [smem:[#allocation5_spill]] %s2311_s0 }
   0x2   :  { %2340 = sst [smem:[#allocation6_spill]] %s2312_s1 }
   0x3   :  { %2341 = sst [smem:[#allocation7_spill]] %s2313_s2 }
   0x4   :  { %2342 = sst [smem:[#allocation8_spill]] %s2314_s3 }
   0x5   :  { %2343 = sst [smem:[#allocation9_spill]] %s2315_s4 }
   0x6   :  { %2344 = sst [smem:[#allocation10_spill]] %s2316_s5 }
   0x7   :  { %2345 = sst [smem:[#allocation11_spill]] %s2317_s6 }
   0x8   :  { %s2346_s29 = sld [smem:[#allocation6_spill]]  ;;  %vm81_vm0 = vcmask 1041408   ;;  %vm77_vm1 = vcmask 31744  }
   0x9   :  { %s2347_s0 = sld [smem:[#allocation5_spill]] }
   0xe   :  { %v76_v0 = vld [vmem:[%s2346_s29] sm:$0x3] }
   0xf   :  { %v72_v1 = vld [vmem:[%s2347_s0] sm:$0xff]  ;;  %v73_v2 = vld [vmem:[%s2347_s0 + $0x8] sm:$0xff]  ;;  %v83_v3 = vsel %vm81_vm0, %v76_v0, 0 }
  0x10   :  { %v74_v4 = vpack.c.bf16 %v73_v2, %v72_v1  ;;  %92 = vmatpush.bf16.msra.mxu0 %v83_v3 }
  0x13   :  { %1278 = vmatmul.msk.bf16.vlgmr.msra.gmra.mxu0 %vm77_vm1, %v74_v4 }
  0x14   :  { %28 = vsyncpa [#allocation3], 0  ;;  %s2348_s6 = sld [smem:[#allocation7_spill]]  ;;  %vm136_vm2 = vcmask 261120   ;;  %v1623_v16 = vmov 32.0   ;;  %vm535_vm0 = vcmask 64512  }
  0x15   :  { %1563 = vrcp.f32 %v1623_v16  ;;  %s2349_s2 = sld [smem:[#allocation10_spill]]  ;;  %v1478_v16 = vld [vmem:[%s2320_s9 + $0x20] sm:$0xf0]  ;;  %s1267_s4 = sshll.u32 %s2333_s22, 4  ;;  %s1268_s4 = int_to_ptr.hbm [resolvable:$true] %s1267_s4 }
  0x16   :  { %s2350_s30 = sld [smem:[#allocation8_spill]] }
  0x17   :  { %s2351_s23 = sld [smem:[#allocation9_spill]] }
  0x18   :  { %s2352_s24 = sld [smem:[#allocation11_spill]] }
  0x1a   :  { %v75_v5 = vld [vmem:[%s2348_s6] sm:$0xff] }
  0x1b   :  { %v1564_v17 = vpop.eup %1563  ;;  %v1473_v26 = vld [vmem:[%s2349_s2 + $0x8] sm:$0xff]  ;;  %v1472_v29 = vld [vmem:[%s2349_s2] sm:$0xff] }
  0x1c   :  { %v144_v18 = vmul.f32 32.0, %v1564_v17  ;;  %vm148_vm3 = vweird.f32 %v1564_v17  ;;  %232 = vmatpush.bf16.msra.mxu1 %v1473_v26  ;;  %v1549_v53 = vld [vmem:[%s2350_s30] ss:$0 sm:$0xff] }
  0x1d   :  { %v1550_v59 = vld [vmem:[%s2351_s23] ss:$0 sm:$0xff] }
  0x1e   :  { %v145_v19 = vsub.f32 1.0, %v144_v18  ;;  %v1551_v0 = vld [vmem:[%s2352_s24] ss:$0 sm:$0xff] }
  0x20   :  { %v146_v20 = vmul.f32 %v1564_v17, %v145_v19  ;;  %233 = vmatpush.bf16.msra.mxu1 %v1472_v29  ;;  %v1474_v29 = vld [vmem:[%s2320_s9 + $0x4] sm:$0xf] }
  0x22   :  { %v147_v21 = vadd.f32 %v1564_v17, %v146_v20  ;;  %v1304_v20 = vld [vmem:[%s2320_s9 + $0x24] sm:$0xf0] }
  0x24   :  { %v1767_v22 = vsel %vm148_vm3, %v1564_v17, %v147_v21  ;;  %v1477_v17 = vld [vmem:[%s2320_s9 + $0x1c] sm:$0xf]  ;;  %v1310_v21 = vld [vmem:[%s2320_s9 + $0x20] sm:$0xf] }
  0x25   :  { %v1307_v26 = vor.u32 %v1477_v17, %v1304_v20 }
  0x27   :  { %364 = vmatpush.bf16.msra.mxu3 %v1307_v26 }
  0x90   :  { %v94_v6 = vpop.f32.mrf.mxu0 }
  0x91   :  { %v1753_v7 = vadd.f32 %v94_v6, %v75_v5 }
  0x93   :  { %v137_v8 = vsel %vm136_vm2, %v1753_v7, 0.0  ;;  %v152_v9 = vmul.f32 %v1753_v7, %v1753_v7 }
  0x94   :  { %138 = vadd.xlane.f32.xlu0 %v137_v8 }
  0x95   :  { %v154_v10 = vsel %vm136_vm2, %v152_v9, 0.0 }
  0x96   :  { %155 = vadd.xlane.f32.xlu1 %v154_v10 }
  0x98   :  { %v96_v11 = vpop.f32.mrf.mxu0 }
  0x99   :  { %v1760_v12 = vadd.f32 %v96_v11, %v75_v5 }
  0x9b   :  { %v140_v13 = vsel %vm136_vm2, %v1760_v12, 0.0  ;;  %v153_v14 = vmul.f32 %v1760_v12, %v1760_v12 }
  0x9c   :  { %141 = vadd.xlane.f32.xlu0 %v140_v13 }
  0x9d   :  { %v157_v15 = vsel %vm136_vm2, %v153_v14, 0.0 }
  0x9e   :  { %158 = vadd.xlane.f32.xlu1 %v157_v15  ;;  %v1302_v15 = vld [vmem:[%s2320_s9 + $0x18] sm:$0xf] }
  0x9f   :  { %v1303_v19 = vor.u32 %v1478_v16, %v1302_v15 }
  0xa1   :  { %350 = vmatpush.bf16.msra.mxu2 %v1303_v19 }
 0x107   :  { %v139_v23 = vpop.xlane.xlu0 %138 }
 0x108   :  { %v150_v24 = vmul.f32 %v1767_v22, %v139_v23  ;;  %v1479_v23 = vld [vmem:[%s2320_s9 + $0x28] sm:$0xf0] }
 0x109   :  { %v156_v25 = vpop.xlane.xlu1 %155 }
 0x10a   :  { %v162_v27 = vmul.f32 %v150_v24, %v150_v24  ;;  %v160_v28 = vmul.f32 %v156_v25, %v1767_v22  ;;  %v188_v50 = vsub.f32 %v1753_v7, %v150_v24 }
 0x10c   :  { %v164_v30 = vsub.f32 %v160_v28, %v162_v27  ;;  %v1290_v27 = vld [vmem:[%s2320_s9] sm:$0xf]  ;;  %v1475_v28 = vld [vmem:[%s2320_s9 + $0x8] sm:$0xf0] }
 0x10e   :  { %v166_v31 = vadd.f32 1e-05, %v164_v30  ;;  %v1311_v30 = vor.u32 %v1479_v23, %v1310_v21 }
 0x10f   :  { %v142_v32 = vpop.xlane.xlu0 %141 }
 0x110   :  { %1565 = vrsqrt.f32 %v166_v31  ;;  %v151_v33 = vmul.f32 %v1767_v22, %v142_v32  ;;  %vm174_vm5 = vweird.f32 %v166_v31  ;;  %v1292_v32 = vld [vmem:[%s2320_s9 + $0xc] sm:$0xf0]  ;;  %378 = vmatpush.bf16.msrb.mxu0 %v1311_v30 }
 0x111   :  { %v159_v34 = vpop.xlane.xlu1 %158 }
 0x112   :  { %v163_v35 = vmul.f32 %v151_v33, %v151_v33  ;;  %v161_v36 = vmul.f32 %v159_v34, %v1767_v22  ;;  %v189_v55 = vsub.f32 %v1760_v12, %v151_v33  ;;  %v1298_v33 = vld [vmem:[%s2320_s9 + $0x8] sm:$0xf]  ;;  %v1476_v34 = vld [vmem:[%s2320_s9 + $0x10] sm:$0xf0] }
 0x114   :  { %v165_v37 = vsub.f32 %v161_v36, %v163_v35  ;;  %v1295_v36 = vor.u32 %v1474_v29, %v1292_v32  ;;  %v1544_v29 = vld [vmem:[%s2323_s12 + $0x28] sm:$0xff]  }
 0x116   :  { %v1566_v38 = vpop.eup %1565  ;;  %v167_v39 = vadd.f32 1e-05, %v165_v37  ;;  %v1299_v37 = vor.u32 %v1476_v34, %v1298_v33  ;;  %365 = vmatpush.bf16.msra.mxu3 %v1295_v36 }
 0x117   :  { %v169_v40 = vmul.f32 %v1566_v38, %v166_v31  ;;  %vm175_vm4 = vweird.f32 %v1566_v38  ;;  %v1291_v31 = vor.u32 %v1475_v28, %v1290_v27 }
 0x118   :  { %1567 = vrsqrt.f32 %v167_v39  ;;  %vm176_vm6 = vmor %vm174_vm5, %vm175_vm4  ;;  %vm184_vm8 = vweird.f32 %v167_v39  ;;  %379 = vmatpush.bf16.msrb.mxu0 %v1299_v37 }
 0x119   :  { %v170_v41 = vmul.f32 %v1566_v38, %v169_v40  ;;  %351 = vmatpush.bf16.msra.mxu2 %v1291_v31 }
 0x11b   :  { %v171_v42 = vmul.f32 0.5, %v170_v41 }
 0x11d   :  { %v172_v43 = vsub.f32 1.5, %v171_v42 }
 0x11e   :  { %v1568_v44 = vpop.eup %1567 }
 0x11f   :  { %v173_v45 = vmul.f32 %v1566_v38, %v172_v43  ;;  %v179_v46 = vmul.f32 %v1568_v44, %v167_v39  ;;  %vm185_vm7 = vweird.f32 %v1568_v44 }
 0x120   :  { %vm186_vm9 = vmor %vm184_vm8, %vm185_vm7 }
 0x121   :  { %v180_v47 = vmul.f32 %v1568_v44, %v179_v46  ;;  %v177_v48 = vsel %vm176_vm6, %v1566_v38, %v173_v45 }
 0x122   :  { %v190_v52 = vmul.f32 %v188_v50, %v177_v48 }
 0x123   :  { %v181_v49 = vmul.f32 0.5, %v180_v47 }
 0x124   :  { %v195_v58 = vmul.f32 %v1549_v53, %v190_v52 }
 0x125   :  { %v182_v51 = vsub.f32 1.5, %v181_v49 }
 0x126   :  { %v200_v61 = vadd.f32 %v1550_v59, %v195_v58 }
 0x127   :  { %v183_v54 = vmul.f32 %v1568_v44, %v182_v51 }
 0x129   :  { %v187_v56 = vsel %vm186_vm9, %v1568_v44, %v183_v54 }
 0x12a   :  { %v191_v57 = vmul.f32 %v189_v55, %v187_v56 }
 0x12c   :  { %v196_v60 = vmul.f32 %v1549_v53, %v191_v57 }
 0x12e   :  { %v201_v62 = vadd.f32 %v1550_v59, %v196_v60  ;;  %v1552_v60 = vld [vmem:[%s2318_s7] ss:$0 sm:$0xff] }
 0x130   :  { %v202_v63 = vpack.c.bf16 %v201_v62, %v200_v61 }
 0x132   :  { %1287 = vmatmul.msk.bf16.vlgmr.msra.gmra.mxu1 %vm136_vm2, %v202_v63 }
 0x1af   :  { %v235_v1 = vpop.f32.mrf.mxu1 }
 0x1b0   :  { %v1791_v2 = vadd.f32 %v1551_v0, %v235_v1 }
 0x1b2   :  { %v242_v3 = vsel %vm136_vm2, %v1791_v2, 0.0  ;;  %v250_v4 = vmul.f32 %v1791_v2, %v1791_v2 }
 0x1b3   :  { %243 = vadd.xlane.f32.xlu2 %v242_v3  ;;  %v1553_v3 = vld [vmem:[%s2319_s8] ss:$0 sm:$0xff] }
 0x1b4   :  { %v252_v5 = vsel %vm136_vm2, %v250_v4, 0.0 }
 0x1b5   :  { %253 = vadd.xlane.f32.xlu0 %v252_v5 }
 0x1b7   :  { %v237_v6 = vpop.f32.mrf.mxu1 }
 0x1b8   :  { %v1798_v8 = vadd.f32 %v1551_v0, %v237_v6 }
 0x1ba   :  { %v245_v9 = vsel %vm136_vm2, %v1798_v8, 0.0  ;;  %v251_v10 = vmul.f32 %v1798_v8, %v1798_v8 }
 0x1bb   :  { %246 = vadd.xlane.f32.xlu2 %v245_v9 }
 0x1bc   :  { %v255_v11 = vsel %vm136_vm2, %v251_v10, 0.0 }
 0x1bd   :  { %256 = vadd.xlane.f32.xlu1 %v255_v11 }
 0x226   :  { %v244_v13 = vpop.xlane.xlu2 %243 }
 0x227   :  { %v248_v14 = vmul.f32 %v244_v13, %v1767_v22 }
 0x228   :  { %v254_v18 = vpop.xlane.xlu0 %253 }
 0x229   :  { %v260_v24 = vmul.f32 %v248_v14, %v248_v14  ;;  %v258_v25 = vmul.f32 %v254_v18, %v1767_v22  ;;  %v286_v57 = vsub.f32 %v1791_v2, %v248_v14  ;;  %v1546_v14 = vld [vmem:[%s2323_s12 + $0x38] sm:$0xff]   ;;  %v1545_v18 = vld [vmem:[%s2323_s12 + $0x30] sm:$0xff]  }
 0x22a   :  { %v1862_v21 = vunpack.c.l.bf16 %v1546_v14  ;;  %v1864_v23 = vunpack.c.h.bf16 %v1546_v14  ;;  %v1870_v27 = vunpack.c.l.bf16 %v1545_v18  ;;  %v1872_v28 = vunpack.c.h.bf16 %v1545_v18 }
 0x22b   :  { %v262_v35 = vsub.f32 %v258_v25, %v260_v24 }
 0x22d   :  { %v264_v38 = vadd.f32 1e-05, %v262_v35  ;;  %v1881_v35 = vunpack.c.l.bf16 %v1544_v29 }
 0x22e   :  { %v247_v39 = vpop.xlane.xlu2 %246 }
 0x22f   :  { %1569 = vrsqrt.f32 %v264_v38  ;;  %v249_v40 = vmul.f32 %v247_v39, %v1767_v22  ;;  %vm272_vm11 = vweird.f32 %v264_v38  ;;  %v1887_v39 = vunpack.c.h.bf16 %v1544_v29 }
 0x230   :  { %v257_v41 = vpop.xlane.xlu1 %256 }
 0x231   :  { %v261_v42 = vmul.f32 %v249_v40, %v249_v40  ;;  %v259_v43 = vmul.f32 %v257_v41, %v1767_v22  ;;  %v287_v62 = vsub.f32 %v1798_v8, %v249_v40  ;;  %v1543_v40 = vld [vmem:[%s2323_s12 + $0x20] sm:$0xff]  }
 0x233   :  { %v263_v44 = vsub.f32 %v259_v43, %v261_v42 }
 0x235   :  { %v1570_v45 = vpop.eup %1569  ;;  %v265_v46 = vadd.f32 1e-05, %v263_v44 }
 0x236   :  { %v267_v47 = vmul.f32 %v1570_v45, %v264_v38  ;;  %vm273_vm10 = vweird.f32 %v1570_v45 }
 0x237   :  { %1571 = vrsqrt.f32 %v265_v46  ;;  %vm274_vm12 = vmor %vm272_vm11, %vm273_vm10  ;;  %vm282_vm14 = vweird.f32 %v265_v46 }
 0x238   :  { %v268_v48 = vmul.f32 %v1570_v45, %v267_v47 }
 0x23a   :  { %v269_v49 = vmul.f32 0.5, %v268_v48 }
 0x23c   :  { %v270_v50 = vsub.f32 1.5, %v269_v49  ;;  %v1906_v49 = vunpack.c.h.bf16 %v1543_v40 }
 0x23d   :  { %v1572_v51 = vpop.eup %1571 }
 0x23e   :  { %v271_v52 = vmul.f32 %v1570_v45, %v270_v50  ;;  %v277_v53 = vmul.f32 %v1572_v51, %v265_v46  ;;  %vm283_vm13 = vweird.f32 %v1572_v51  ;;  %v1542_v50 = vld [vmem:[%s2323_s12 + $0x18] sm:$0xff]  }
 0x23f   :  { %vm284_vm15 = vmor %vm282_vm14, %vm283_vm13 }
 0x240   :  { %v278_v54 = vmul.f32 %v1572_v51, %v277_v53  ;;  %v275_v55 = vsel %vm274_vm12, %v1570_v45, %v271_v52  ;;  %v1900_v45 = vunpack.c.l.bf16 %v1543_v40  ;;  %v1911_v52 = vunpack.c.l.bf16 %v1542_v50 }
 0x241   :  { %v288_v59 = vmul.f32 %v286_v57, %v275_v55  ;;  %v1541_v57 = vld [vmem:[%s2323_s12 + $0x10] sm:$0xff]  }
 0x242   :  { %v279_v56 = vmul.f32 0.5, %v278_v54 }
 0x243   :  { %v293_v1 = vmul.f32 %v1552_v60, %v288_v59 }
 0x244   :  { %v280_v58 = vsub.f32 1.5, %v279_v56  ;;  %v1917_v56 = vunpack.c.h.bf16 %v1542_v50 }
 0x245   :  { %v298_v4 = vadd.f32 %v1553_v3, %v293_v1  ;;  %v1540_v1 = vld [vmem:[%s2323_s12 + $0x8] sm:$0xff]  }
 0x246   :  { %v281_v61 = vmul.f32 %v1572_v51, %v280_v58 }
 0x248   :  { %v285_v63 = vsel %vm284_vm15, %v1572_v51, %v281_v61  ;;  %vm1195_vm15 = vcmask 130048  }
 0x249   :  { %v289_v0 = vmul.f32 %v287_v62, %v285_v63 }
 0x24b   :  { %v294_v2 = vmul.f32 %v1552_v60, %v289_v0  ;;  %v1926_v60 = vunpack.c.l.bf16 %v1541_v57  ;;  %v1932_v0 = vunpack.c.h.bf16 %v1541_v57  ;;  %v127_v57 = vld [vmem:[%s2325_s14 + $0x50] sm:$0xff] }
 0x24d   :  { %v299_v5 = vadd.f32 %v1553_v3, %v294_v2  ;;  %v1937_v2 = vunpack.c.l.bf16 %v1540_v1 }
 0x24f   :  { %v300_v6 = vpack.c.bf16 %v299_v5, %v298_v4 }
 0x251   :  { %1312 = vmatmul.msk.bf16.vlgmr.msra.gmra.mxu2 %vm136_vm2, %v300_v6  ;;  %1313 = vmatmul.msk.bf16.vlgmr.msra.gmra.mxu3 %vm136_vm2, %v300_v6 }
 0x252   :  { %1314 = vmatmul.msk.bf16.vlgmr.msrb.gmra.mxu0 %vm136_vm2, %v300_v6 }
 0x2cf   :  { %v381_v9 = vpop.f32.mrf.mxu0 }
 0x2d0   :  { %v389_v10 = vpack.c.bf16 %v381_v9, %v381_v9  ;;  %v1943_v9 = vunpack.c.h.bf16 %v1540_v1 }
 0x2d2   :  { %v441_v15 = vunpack.c.l.b16 %v389_v10 }
 0x2d4   :  { %v367_v8 = vpop.f32.mrf.mxu3 }
 0x2d5   :  { %v387_v17 = vpack.c.bf16 %v367_v8, %v367_v8  ;;  %v1509_v8 = vld [vmem:[%s2323_s12] sm:$0xff]  }
 0x2d7   :  { %v383_v11 = vpop.f32.mrf.mxu0  ;;  %v393_v30 = vunpack.c.l.b16 %v387_v17  ;;  %v1958_v17 = vunpack.c.h.bf16 %v1509_v8 }
 0x2d8   :  { %v390_v13 = vpack.c.bf16 %v383_v11, %v383_v11 }
 0x2da   :  { %v442_v16 = vunpack.c.l.b16 %v390_v13  ;;  %v1952_v13 = vunpack.c.l.bf16 %v1509_v8  ;;  %v122_v8 = vld [vmem:[%s2325_s14 + $0x28] sm:$0xff] }
 0x2dc   :  { %v443_v19 = vpack.c.b16 %v442_v16, %v441_v15  ;;  %v369_v20 = vpop.f32.mrf.mxu3 }
 0x2dd   :  { %v388_v24 = vpack.c.bf16 %v369_v20, %v369_v20 }
 0x2de   :  { %v1866_v25 = vunpack.c.l.bf16 %v443_v19  ;;  %v1868_v26 = vunpack.c.h.bf16 %v443_v19 }
 0x2df   :  { %v394_v31 = vunpack.c.l.b16 %v388_v24 }
 0x2e0   :  { %v461_v32 = vmul.f32 %v1862_v21, %v1866_v25  ;;  %v462_v33 = vmul.f32 %v1864_v23, %v1868_v26  ;;  %v459_v37 = vmul.f32 %v1870_v27, %v1866_v25  ;;  %v460_v38 = vmul.f32 %v1872_v28, %v1868_v26 }
 0x2e1   :  { %v395_v34 = vpack.c.b16 %v394_v31, %v393_v30  ;;  %v457_v47 = vmul.f32 %v1881_v35, %v1866_v25  ;;  %v458_v48 = vmul.f32 %v1887_v39, %v1868_v26  ;;  %v455_v54 = vmul.f32 %v1900_v45, %v1866_v25 }
 0x2e2   :  { %v470_v36 = vpack.c.bf16 %v462_v33, %v461_v32  ;;  %v469_v46 = vpack.c.bf16 %v460_v38, %v459_v37  ;;  %v456_v55 = vmul.f32 %v1906_v49, %v1868_v26  ;;  %v453_v62 = vmul.f32 %v1911_v52, %v1866_v25 }
 0x2e3   :  { %v1892_v41 = vunpack.c.l.bf16 %v395_v34  ;;  %v1894_v42 = vunpack.c.h.bf16 %v395_v34  ;;  %v468_v53 = vpack.c.bf16 %v458_v48, %v457_v47  ;;  %v454_v63 = vmul.f32 %v1917_v56, %v1868_v26 }
 0x2e4   :  { %521 = vmatpush.bf16.msrb.mxu3 %v470_v36  ;;  %v467_v61 = vpack.c.bf16 %v456_v55, %v455_v54  ;;  %v451_v5 = vmul.f32 %v1926_v60, %v1866_v25  ;;  %v452_v6 = vmul.f32 %v1932_v0, %v1868_v26  ;;  %v449_v15 = vmul.f32 %v1937_v2, %v1866_v25  ;;  %v131_v54 = vld [vmem:[%s2325_s14 + $0x70] sm:$0xff]  ;;  %v128_v55 = vld [vmem:[%s2325_s14 + $0x58] sm:$0xff] }
 0x2e5   :  { %v429_v43 = vmul.f32 %v1862_v21, %v1892_v41  ;;  %v430_v44 = vmul.f32 %v1864_v23, %v1894_v42  ;;  %v427_v58 = vmul.f32 %v1870_v27, %v1892_v41  ;;  %v428_v59 = vmul.f32 %v1872_v28, %v1894_v42 }
 0x2e6   :  { %v466_v4 = vpack.c.bf16 %v454_v63, %v453_v62  ;;  %v425_v10 = vmul.f32 %v1881_v35, %v1892_v41  ;;  %v426_v11 = vmul.f32 %v1887_v39, %v1894_v42  ;;  %v465_v14 = vpack.c.bf16 %v452_v6, %v451_v5  ;;  %v123_v62 = vld [vmem:[%s2325_s14 + $0x30] sm:$0xff]  ;;  %v2017_v63 = vld [vmem:[%s2324_s13] sm:$0xff] }
 0x2e7   :  { %v438_v51 = vpack.c.bf16 %v430_v44, %v429_v43  ;;  %v437_v3 = vpack.c.bf16 %v428_v59, %v427_v58  ;;  %v450_v16 = vmul.f32 %v1943_v9, %v1868_v26  ;;  %v447_v20 = vmul.f32 %v1952_v13, %v1866_v25  ;;  %v353_v44 = vpop.f32.mrf.mxu2  ;;  %v126_v58 = vld [vmem:[%s2325_s14 + $0x48] sm:$0xff]  ;;  %v125_v59 = vld [vmem:[%s2325_s14 + $0x40] sm:$0xff] }
 0x2e8   :  { %522 = vmatpush.bf16.msrb.mxu3 %v469_v46  ;;  %v436_v18 = vpack.c.bf16 %v426_v11, %v425_v10  ;;  %v448_v24 = vmul.f32 %v1958_v17, %v1868_v26  ;;  %v423_v29 = vmul.f32 %v1900_v45, %v1892_v41  ;;  %v424_v30 = vmul.f32 %v1906_v49, %v1894_v42  ;;  %v121_v10 = vld [vmem:[%s2325_s14 + $0x20] sm:$0xff]  ;;  %v120_v11 = vld [vmem:[%s2325_s14 + $0x18] sm:$0xff] }
 0x2e9   :  { %471 = vmatpush.bf16.xpose.msrb.mxu1 %v438_v51  ;;  %v464_v19 = vpack.c.bf16 %v450_v16, %v449_v15  ;;  %v421_v33 = vmul.f32 %v1911_v52, %v1892_v41  ;;  %v422_v25 = vmul.f32 %v1917_v56, %v1894_v42  ;;  %v419_v26 = vmul.f32 %v1926_v60, %v1892_v41  ;;  %v118_v15 = vld [vmem:[%s2325_s14 + $0x8] sm:$0xff]  ;;  %v117_v16 = vld [vmem:[%s2325_s14] sm:$0xff] }
 0x2ea   :  { %v463_v31 = vpack.c.bf16 %v448_v24, %v447_v20  ;;  %v435_v32 = vpack.c.bf16 %v424_v30, %v423_v29  ;;  %v420_v36 = vmul.f32 %v1932_v0, %v1894_v42  ;;  %v417_v38 = vmul.f32 %v1937_v2, %v1892_v41 }
 0x2eb   :  { %v434_v34 = vpack.c.bf16 %v422_v25, %v421_v33  ;;  %v418_v40 = vmul.f32 %v1943_v9, %v1894_v42  ;;  %v415_v46 = vmul.f32 %v1952_v13, %v1892_v41  ;;  %v416_v47 = vmul.f32 %v1958_v17, %v1894_v42  ;;  %v130_v41 = vld [vmem:[%s2325_s14 + $0x68] sm:$0xff]  ;;  %v129_v42 = vld [vmem:[%s2325_s14 + $0x60] sm:$0xff] }
 0x2ec   :  { %523 = vmatpush.bf16.msrb.mxu3 %v468_v53  ;;  %v433_v37 = vpack.c.bf16 %v420_v36, %v419_v26  ;;  %v132_v53 = vld [vmem:[%s2325_s14 + $0x78] sm:$0xff]  ;;  %v2047_v25 = vld [vmem:[%s2326_s15] sm:$0xff]  ;;  %v1486_v26 = vld [vmem:[%s2321_s10 + $0x30] sm:$0xff]  ;;  %s1624_s15 = smov [#allocation2]  }
 0x2ed   :  { %v432_v43 = vpack.c.bf16 %v418_v40, %v417_v38  ;;  %v431_v48 = vpack.c.bf16 %v416_v47, %v415_v46  ;;  %495 = vmatpush.msrb.mxu2 %v132_v53  ;;  %557 = vmatpush.msra.mxu0 %v2047_v25  ;;  %v1485_v36 = vld [vmem:[%s2321_s10 + $0x28] sm:$0xff]  ;;  %v1483_v40 = vld [vmem:[%s2321_s10 + $0x18] sm:$0xff]  ;;  %v1482_v47 = vld [vmem:[%s2321_s10 + $0x10] sm:$0xff]  ;;  %s1265_s28 = sshll.u32 %s1624_s15, 4  ;;  %s1266_s28 = int_to_ptr.vmem [resolvable:$true] %s1265_s28 }
 0x2ef   :  { %v355_v50 = vpop.f32.mrf.mxu2  ;;  %496 = vmatpush.msrb.mxu2 %v131_v54 }
 0x2f0   :  { %524 = vmatpush.bf16.msrb.mxu3 %v467_v61  ;;  %v386_v51 = vpack.c.bf16 %v355_v50, %v353_v44  ;;  %v124_v61 = vld [vmem:[%s2325_s14 + $0x38] sm:$0xff]  ;;  %v1480_v50 = vld [vmem:[%s2321_s10] sm:$0xff] }
 0x2f1   :  { %472 = vmatpush.bf16.xpose.msrb.mxu1 %v437_v3  ;;  %497 = vmatpush.msrb.mxu2 %v130_v41 }
 0x2f3   :  { %498 = vmatpush.msrb.mxu2 %v129_v42 }
 0x2f4   :  { %525 = vmatpush.bf16.msrb.mxu3 %v466_v4  ;;  %v2023_v4 = vld [vmem:[%s2324_s13 + $0x8] sm:$0xff] }
 0x2f5   :  { %499 = vmatpush.msrb.mxu2 %v128_v55 }
 0x2f7   :  { %500 = vmatpush.msrb.mxu2 %v127_v57 }
 0x2f8   :  { %526 = vmatpush.bf16.msrb.mxu3 %v465_v14  ;;  %v119_v14 = vld [vmem:[%s2325_s14 + $0x10] sm:$0xff] }
 0x2f9   :  { %473 = vmatpush.bf16.xpose.msrb.mxu1 %v436_v18  ;;  %501 = vmatpush.msrb.mxu2 %v126_v58 }
 0x2fb   :  { %502 = vmatpush.msrb.mxu2 %v125_v59 }
 0x2fc   :  { %527 = vmatpush.bf16.msrb.mxu3 %v464_v19 }
 0x2fd   :  { %503 = vmatpush.msrb.mxu2 %v124_v61 }
 0x2ff   :  { %504 = vmatpush.msrb.mxu2 %v123_v62 }
 0x300   :  { %528 = vmatpush.bf16.msrb.mxu3 %v463_v31 }
 0x301   :  { %474 = vmatpush.bf16.xpose.msrb.mxu1 %v435_v32  ;;  %505 = vmatpush.msrb.mxu2 %v122_v8 }
 0x303   :  { %506 = vmatpush.msrb.mxu2 %v121_v10 }
 0x305   :  { %507 = vmatpush.msrb.mxu2 %v120_v11 }
 0x307   :  { %508 = vmatpush.msrb.mxu2 %v119_v14 }
 0x309   :  { %475 = vmatpush.bf16.xpose.msrb.mxu1 %v434_v34  ;;  %509 = vmatpush.msrb.mxu2 %v118_v15  ;;  %v1487_v34 = vld [vmem:[%s2321_s10 + $0x38] sm:$0xff] }
 0x30a   :  { %636 = vmatpush.bf16.msrb.mxu0 %v1487_v34 }
 0x30b   :  { %510 = vmatpush.msrb.mxu2 %v117_v16 }
 0x30e   :  { %637 = vmatpush.bf16.msrb.mxu0 %v1486_v26 }
 0x311   :  { %476 = vmatpush.bf16.xpose.msrb.mxu1 %v433_v37  ;;  %v1484_v37 = vld [vmem:[%s2321_s10 + $0x20] sm:$0xff] }
 0x312   :  { %638 = vmatpush.bf16.msrb.mxu0 %v1485_v36 }
 0x316   :  { %639 = vmatpush.bf16.msrb.mxu0 %v1484_v37 }
 0x319   :  { %477 = vmatpush.bf16.xpose.msrb.mxu1 %v432_v43 }
 0x31a   :  { %640 = vmatpush.bf16.msrb.mxu0 %v1483_v40 }
 0x31e   :  { %641 = vmatpush.bf16.msrb.mxu0 %v1482_v47 }
 0x321   :  { %478 = vmatpush.bf16.xpose.msrb.mxu1 %v431_v48  ;;  %v1481_v48 = vld [vmem:[%s2321_s10 + $0x8] sm:$0xff] }
 0x322   :  { %642 = vmatpush.bf16.msrb.mxu0 %v1481_v48 }
 0x326   :  { %643 = vmatpush.bf16.msrb.mxu0 %v1480_v50 }
 0x328   :  { %479 = vmatmul.bf16.vlgmr.msrb.gmra.mxu1 %v386_v51 }
 0x329   :  { %996 = vmatpush.msra.mxu1 %v132_v53 }
 0x32b   :  { %997 = vmatpush.msra.mxu1 %v131_v54 }
 0x32d   :  { %998 = vmatpush.msra.mxu1 %v130_v41 }
 0x32f   :  { %999 = vmatpush.msra.mxu1 %v129_v42 }
 0x331   :  { %1000 = vmatpush.msra.mxu1 %v128_v55 }
 0x333   :  { %1001 = vmatpush.msra.mxu1 %v127_v57 }
 0x335   :  { %1002 = vmatpush.msra.mxu1 %v126_v58  ;;  %v1554_v58 = vld [vmem:[%s2322_s11] ss:$0 sm:$0xff] }
 0x337   :  { %1003 = vmatpush.msra.mxu1 %v125_v59 }
 0x339   :  { %1004 = vmatpush.msra.mxu1 %v124_v61 }
 0x33b   :  { %1005 = vmatpush.msra.mxu1 %v123_v62 }
 0x33d   :  { %1006 = vmatpush.msra.mxu1 %v122_v8 }
 0x33f   :  { %1007 = vmatpush.msra.mxu1 %v121_v10 }
 0x341   :  { %1008 = vmatpush.msra.mxu1 %v120_v11 }
 0x343   :  { %1009 = vmatpush.msra.mxu1 %v119_v14 }
 0x345   :  { %1010 = vmatpush.msra.mxu1 %v118_v15 }
 0x347   :  { %1011 = vmatpush.msra.mxu1 %v117_v16 }
 0x3a5   :  { %v480_v1 = vpop.f32.mrf.mxu1 }
 0x3a6   :  { %v481_v3 = vadd.f32 %v480_v1, %v2017_v63 }
 0x3a8   :  { %485 = vmax.xlane.f32.xlu2 %v481_v3 }
 0x3ad   :  { %v482_v5 = vpop.f32.mrf.mxu1 }
 0x3ae   :  { %v483_v6 = vadd.f32 %v482_v5, %v2023_v4 }
 0x3b0   :  { %487 = vmax.xlane.f32.xlu0 %v483_v6 }
 0x41b   :  { %v486_v18 = vpop.xlane.xlu2 %485 }
 0x41c   :  { %v489_v19 = vsub.f32 %v481_v3, %v486_v18 }
 0x41e   :  { %v491_v20 = vmul.f32 1.442695, %v489_v19 }
 0x420   :  { %1573 = vpow2.f32 %v491_v20 }
 0x423   :  { %v488_v24 = vpop.xlane.xlu0 %487 }
 0x424   :  { %v490_v29 = vsub.f32 %v483_v6, %v488_v24 }
 0x426   :  { %v1574_v30 = vpop.eup %1573  ;;  %v493_v31 = vmul.f32 1.442695, %v490_v29 }
 0x427   :  { %511 = vmatmul.f32.vlgmr.msrb.gmra.mxu2 %v1574_v30 }
 0x428   :  { %1575 = vpow2.f32 %v493_v31 }
 0x42e   :  { %v1576_v32 = vpop.eup %1575 }
 0x42f   :  { %514 = vmatmul.f32.gmra.mxu2 %v1576_v32  ;;  %v520_v33 = vpack.c.bf16 %v1576_v32, %v1574_v30  ;;  %v1488_v30 = vld [vmem:[%s2349_s2 + $0x10] sm:$0xff] }
 0x431   :  { %529 = vmatmul.bf16.vlgmr.msrb.gmra.mxu3 %v520_v33 }
 0x4aa   :  { %v512_v38 = vpop.f32.mrf.mxu2 }
 0x4ab   :  { %1577 = vrcp.f32 %v512_v38 }
 0x4b1   :  { %v1578_v43 = vpop.eup %1577 }
 0x4b2   :  { %v515_v44 = vpop.f32.mrf.mxu2  ;;  %1315 = vmatmul.msk.f32.vlgmr.msra.gmra.mxu0 %vm535_vm0, %v1578_v43 }
 0x4b3   :  { %1579 = vrcp.f32 %v515_v44 }
 0x4b4   :  { %v530_v51 = vpop.f32.mrf.mxu3 }
 0x4b9   :  { %v1580_v46 = vpop.eup %1579 }
 0x4ba   :  { %1316 = vmatmul.msk.f32.gmra.mxu0 %vm535_vm0, %v1580_v46 }
 0x4bc   :  { %v532_v54 = vpop.f32.mrf.mxu3 }
 0x52f   :  { %v559_v53 = vpop.f32.mrf.mxu0 }
 0x530   :  { %v565_v42 = vmul.f32 %v559_v53, %v530_v51 }
 0x537   :  { %v562_v41 = vpop.f32.mrf.mxu0 }
 0x538   :  { %v566_v55 = vmul.f32 %v562_v41, %v532_v54 }
 0x53a   :  { %v567_v57 = vpack.c.bf16 %v566_v55, %v565_v42  ;;  %v1555_v55 = vld [vmem:[%s2350_s30 + $0x1] ss:$0 sm:$0xff] }
 0x53c   :  { %644 = vmatmul.bf16.vlgmr.msrb.gmra.mxu0 %v567_v57 }
 0x5b9   :  { %v645_v59 = vpop.f32.mrf.mxu0 }
 0x5ba   :  { %v646_v61 = vadd.f32 %v1554_v58, %v645_v59 }
 0x5bc   :  { %v2080_v62 = vadd.f32 %v646_v61, %v1753_v7 }
 0x5be   :  { %v656_v1 = vsel %vm136_vm2, %v2080_v62, 0.0  ;;  %v664_v3 = vmul.f32 %v2080_v62, %v2080_v62 }
 0x5bf   :  { %657 = vadd.xlane.f32.xlu1 %v656_v1 }
 0x5c0   :  { %v666_v5 = vsel %vm136_vm2, %v664_v3, 0.0 }
 0x5c1   :  { %v647_v6 = vpop.f32.mrf.mxu0  ;;  %667 = vadd.xlane.f32.xlu0 %v666_v5  ;;  %v1556_v5 = vld [vmem:[%s2351_s23 + $0x1] ss:$0 sm:$0xff] }
 0x5c2   :  { %v648_v8 = vadd.f32 %v1554_v58, %v647_v6 }
 0x5c4   :  { %v2088_v10 = vadd.f32 %v648_v8, %v1760_v12  ;;  %v1489_v12 = vld [vmem:[%s2349_s2 + $0x18] sm:$0xff] }
 0x5c5   :  { %746 = vmatpush.bf16.msra.mxu2 %v1489_v12 }
 0x5c6   :  { %v659_v11 = vsel %vm136_vm2, %v2088_v10, 0.0  ;;  %v665_v7 = vmul.f32 %v2088_v10, %v2088_v10 }
 0x5c7   :  { %660 = vadd.xlane.f32.xlu2 %v659_v11 }
 0x5c8   :  { %v669_v14 = vsel %vm136_vm2, %v665_v7, 0.0 }
 0x5c9   :  { %670 = vadd.xlane.f32.xlu1 %v669_v14  ;;  %747 = vmatpush.bf16.msra.mxu2 %v1488_v30  ;;  %v1557_v14 = vld [vmem:[%s2352_s24 + $0x1] ss:$0 sm:$0xff] }
 0x632   :  { %v658_v15 = vpop.xlane.xlu1 %657 }
 0x633   :  { %v662_v16 = vmul.f32 %v658_v15, %v1767_v22 }
 0x634   :  { %v668_v18 = vpop.xlane.xlu0 %667 }
 0x635   :  { %v674_v19 = vmul.f32 %v662_v16, %v662_v16  ;;  %v672_v20 = vmul.f32 %v668_v18, %v1767_v22  ;;  %v700_v41 = vsub.f32 %v2080_v62, %v662_v16 }
 0x637   :  { %v676_v24 = vsub.f32 %v672_v20, %v674_v19 }
 0x639   :  { %v678_v29 = vadd.f32 1e-05, %v676_v24 }
 0x63a   :  { %v661_v31 = vpop.xlane.xlu2 %660 }
 0x63b   :  { %1581 = vrsqrt.f32 %v678_v29  ;;  %v663_v32 = vmul.f32 %v661_v31, %v1767_v22  ;;  %vm686_vm4 = vweird.f32 %v678_v29 }
 0x63c   :  { %v671_v33 = vpop.xlane.xlu1 %670 }
 0x63d   :  { %v675_v34 = vmul.f32 %v663_v32, %v663_v32  ;;  %v673_v26 = vmul.f32 %v671_v33, %v1767_v22  ;;  %v701_v59 = vsub.f32 %v2088_v10, %v663_v32 }
 0x63f   :  { %v677_v36 = vsub.f32 %v673_v26, %v675_v34 }
 0x641   :  { %v1582_v37 = vpop.eup %1581  ;;  %v679_v38 = vadd.f32 1e-05, %v677_v36 }
 0x642   :  { %v681_v40 = vmul.f32 %v1582_v37, %v678_v29  ;;  %vm687_vm3 = vweird.f32 %v1582_v37 }
 0x643   :  { %1583 = vrsqrt.f32 %v679_v38  ;;  %vm688_vm5 = vmor %vm686_vm4, %vm687_vm3  ;;  %vm696_vm7 = vweird.f32 %v679_v38 }
 0x644   :  { %v682_v43 = vmul.f32 %v1582_v37, %v681_v40  ;;  %v1494_v40 = vld [vmem:[%s2320_s9 + $0x50] sm:$0xf0] }
 0x646   :  { %v683_v44 = vmul.f32 0.5, %v682_v43  ;;  %v1493_v43 = vld [vmem:[%s2320_s9 + $0x4c] sm:$0xf] }
 0x648   :  { %v684_v46 = vsub.f32 1.5, %v683_v44 }
 0x649   :  { %v1584_v47 = vpop.eup %1583 }
 0x64a   :  { %v685_v48 = vmul.f32 %v1582_v37, %v684_v46  ;;  %v691_v50 = vmul.f32 %v1584_v47, %v679_v38  ;;  %vm697_vm6 = vweird.f32 %v1584_v47  ;;  %v1389_v38 = vld [vmem:[%s2320_s9 + $0x48] sm:$0xf]  ;;  %v1391_v46 = vld [vmem:[%s2320_s9 + $0x54] sm:$0xf0] }
 0x64b   :  { %vm698_vm8 = vmor %vm696_vm7, %vm697_vm6  ;;  %v1390_v44 = vor.u32 %v1494_v40, %v1389_v38 }
 0x64c   :  { %v692_v51 = vmul.f32 %v1584_v47, %v691_v50  ;;  %v689_v53 = vsel %vm688_vm5, %v1582_v37, %v685_v48  ;;  %v1491_v48 = vld [vmem:[%s2320_s9 + $0x38] sm:$0xf0] }
 0x64d   :  { %v702_v57 = vmul.f32 %v700_v41, %v689_v53  ;;  %v1490_v53 = vld [vmem:[%s2320_s9 + $0x34] sm:$0xf]  ;;  %867 = vmatpush.bf16.msra.mxu3 %v1390_v44 }
 0x64e   :  { %v693_v54 = vmul.f32 0.5, %v692_v51  ;;  %v1394_v51 = vor.u32 %v1493_v43, %v1391_v46 }
 0x64f   :  { %v707_v1 = vmul.f32 %v1555_v55, %v702_v57 }
 0x650   :  { %v694_v42 = vsub.f32 1.5, %v693_v54  ;;  %v1379_v54 = vld [vmem:[%s2320_s9 + $0x3c] sm:$0xf0]  ;;  %881 = vmatpush.bf16.msrb.mxu2 %v1394_v51 }
 0x651   :  { %v712_v8 = vadd.f32 %v1556_v5, %v707_v1  ;;  %v1382_v57 = vor.u32 %v1490_v53, %v1379_v54  ;;  %v1397_v1 = vld [vmem:[%s2320_s9 + $0x50] sm:$0xf] }
 0x652   :  { %v695_v58 = vmul.f32 %v1584_v47, %v694_v42 }
 0x654   :  { %v699_v61 = vsel %vm698_vm8, %v1584_v47, %v695_v58  ;;  %v1377_v47 = vld [vmem:[%s2320_s9 + $0x30] sm:$0xf]  ;;  %882 = vmatpush.bf16.msrb.mxu2 %v1382_v57 }
 0x655   :  { %v703_v3 = vmul.f32 %v701_v59, %v699_v61  ;;  %v1378_v42 = vor.u32 %v1491_v48, %v1377_v47  ;;  %v1559_v48 = vld [vmem:[%s2319_s8 + $0x1] ss:$0 sm:$0xff] }
 0x657   :  { %v708_v6 = vmul.f32 %v1555_v55, %v703_v3  ;;  %v1495_v3 = vld [vmem:[%s2320_s9 + $0x58] sm:$0xf0]  ;;  %868 = vmatpush.bf16.msra.mxu3 %v1378_v42 }
 0x659   :  { %v713_v11 = vadd.f32 %v1556_v5, %v708_v6  ;;  %v1385_v5 = vld [vmem:[%s2320_s9 + $0x38] sm:$0xf]  ;;  %v1398_v6 = vor.u32 %v1495_v3, %v1397_v1 }
 0x65b   :  { %v714_v7 = vpack.c.bf16 %v713_v11, %v712_v8  ;;  %v1492_v8 = vld [vmem:[%s2320_s9 + $0x40] sm:$0xf0]  ;;  %895 = vmatpush.bf16.msrb.mxu3 %v1398_v6 }
 0x65d   :  { %1364 = vmatmul.msk.bf16.vlgmr.msra.gmra.mxu2 %vm136_vm2, %v714_v7 }
 0x6e0   :  { %v749_v15 = vpop.f32.mrf.mxu2 }
 0x6e1   :  { %v2117_v16 = vadd.f32 %v1557_v14, %v749_v15 }
 0x6e3   :  { %v758_v18 = vsel %vm136_vm2, %v2117_v16, 0.0  ;;  %v766_v19 = vmul.f32 %v2117_v16, %v2117_v16 }
 0x6e4   :  { %759 = vadd.xlane.f32.xlu2 %v758_v18 }
 0x6e5   :  { %v768_v20 = vsel %vm136_vm2, %v766_v19, 0.0 }
 0x6e6   :  { %769 = vadd.xlane.f32.xlu1 %v768_v20 }
 0x6e8   :  { %v751_v24 = vpop.f32.mrf.mxu2 }
 0x6e9   :  { %v2124_v12 = vadd.f32 %v1557_v14, %v751_v24 }
 0x6eb   :  { %v761_v29 = vsel %vm136_vm2, %v2124_v12, 0.0  ;;  %v767_v30 = vmul.f32 %v2124_v12, %v2124_v12 }
 0x6ec   :  { %762 = vadd.xlane.f32.xlu0 %v761_v29 }
 0x6ed   :  { %v771_v31 = vsel %vm136_vm2, %v767_v30, 0.0 }
 0x6ee   :  { %772 = vadd.xlane.f32.xlu2 %v771_v31 }
 0x757   :  { %v760_v32 = vpop.xlane.xlu2 %759 }
 0x758   :  { %v764_v33 = vmul.f32 %v760_v32, %v1767_v22 }
 0x759   :  { %v770_v34 = vpop.xlane.xlu1 %769 }
 0x75a   :  { %v776_v26 = vmul.f32 %v764_v33, %v764_v33  ;;  %v774_v36 = vmul.f32 %v770_v34, %v1767_v22 }
 0x75c   :  { %v778_v37 = vsub.f32 %v774_v36, %v776_v26  ;;  %v802_v26 = vsub.f32 %v2117_v16, %v764_v33 }
 0x75e   :  { %v780_v50 = vadd.f32 1e-05, %v778_v37  ;;  %v1558_v37 = vld [vmem:[%s2318_s7 + $0x1] ss:$0 sm:$0xff] }
 0x75f   :  { %v763_v41 = vpop.xlane.xlu0 %762 }
 0x760   :  { %1585 = vrsqrt.f32 %v780_v50  ;;  %v765_v55 = vmul.f32 %v763_v41, %v1767_v22  ;;  %vm788_vm10 = vweird.f32 %v780_v50 }
 0x761   :  { %v773_v58 = vpop.xlane.xlu2 %772 }
 0x762   :  { %v777_v59 = vmul.f32 %v765_v55, %v765_v55  ;;  %v775_v61 = vmul.f32 %v773_v58, %v1767_v22  ;;  %v1386_v22 = vor.u32 %v1492_v8, %v1385_v5  ;;  %v803_v43 = vsub.f32 %v2124_v12, %v765_v55 }
 0x764   :  { %v779_v11 = vsub.f32 %v775_v61, %v777_v59  ;;  %896 = vmatpush.bf16.msrb.mxu3 %v1386_v22 }
 0x766   :  { %v1586_v7 = vpop.eup %1585  ;;  %v781_v14 = vadd.f32 1e-05, %v779_v11 }
 0x767   :  { %v783_v15 = vmul.f32 %v1586_v7, %v780_v50  ;;  %vm789_vm9 = vweird.f32 %v1586_v7 }
 0x768   :  { %1587 = vrsqrt.f32 %v781_v14  ;;  %vm790_vm11 = vmor %vm788_vm10, %vm789_vm9  ;;  %vm798_vm13 = vweird.f32 %v781_v14 }
 0x769   :  { %v784_v18 = vmul.f32 %v1586_v7, %v783_v15 }
 0x76b   :  { %v785_v19 = vmul.f32 0.5, %v784_v18 }
 0x76d   :  { %v786_v20 = vsub.f32 1.5, %v785_v19 }
 0x76e   :  { %v1588_v24 = vpop.eup %1587 }
 0x76f   :  { %v787_v29 = vmul.f32 %v1586_v7, %v786_v20  ;;  %v793_v30 = vmul.f32 %v1588_v24, %v781_v14  ;;  %vm799_vm12 = vweird.f32 %v1588_v24 }
 0x770   :  { %vm800_vm14 = vmor %vm798_vm13, %vm799_vm12 }
 0x771   :  { %v794_v31 = vmul.f32 %v1588_v24, %v793_v30  ;;  %v791_v32 = vsel %vm790_vm11, %v1586_v7, %v787_v29 }
 0x772   :  { %v804_v38 = vmul.f32 %v802_v26, %v791_v32 }
 0x773   :  { %v795_v34 = vmul.f32 0.5, %v794_v31 }
 0x774   :  { %v809_v46 = vmul.f32 %v1558_v37, %v804_v38 }
 0x775   :  { %v796_v36 = vsub.f32 1.5, %v795_v34 }
 0x776   :  { %v814_v33 = vadd.f32 %v1559_v48, %v809_v46 }
 0x777   :  { %v797_v40 = vmul.f32 %v1588_v24, %v796_v36 }
 0x779   :  { %v801_v44 = vsel %vm800_vm14, %v1588_v24, %v797_v40 }
 0x77a   :  { %v805_v47 = vmul.f32 %v803_v43, %v801_v44 }
 0x77c   :  { %v810_v16 = vmul.f32 %v1558_v37, %v805_v47 }
 0x77e   :  { %v815_v50 = vadd.f32 %v1559_v48, %v810_v16 }
 0x780   :  { %v816_v51 = vpack.c.bf16 %v815_v50, %v814_v33 }
 0x782   :  { %1399 = vmatmul.msk.bf16.vlgmr.msra.gmra.mxu3 %vm136_vm2, %v816_v51  ;;  %1400 = vmatmul.msk.bf16.vlgmr.msrb.gmra.mxu2 %vm136_vm2, %v816_v51 }
 0x783   :  { %1057 = vmatpush.msra.mxu3 %v2047_v25 }
 0x792   :  { %1401 = vmatmul.msk.bf16.vlgmr.msrb.gmra.mxu3 %vm136_vm2, %v816_v51 }
 0x805   :  { %v2183_v12 = vpop.f32.mrf.mxu3  ;;  %v884_v53 = vpop.f32.mrf.mxu2 }
 0x806   :  { %v904_v54 = vpack.c.bf16 %v884_v53, %v884_v53 }
 0x808   :  { %v910_v58 = vunpack.c.l.b16 %v904_v54 }
 0x80d   :  { %v2185_v41 = vpop.f32.mrf.mxu3  ;;  %v886_v42 = vpop.f32.mrf.mxu2 }
 0x80e   :  { %v903_v55 = vpack.c.bf16 %v2185_v41, %v2183_v12  ;;  %v905_v57 = vpack.c.bf16 %v886_v42, %v886_v42 }
 0x810   :  { %v911_v59 = vunpack.c.l.b16 %v905_v57 }
 0x812   :  { %v912_v61 = vpack.c.b16 %v911_v59, %v910_v58 }
 0x814   :  { %v2189_v1 = vunpack.c.l.bf16 %v912_v61  ;;  %v2191_v3 = vunpack.c.h.bf16 %v912_v61 }
 0x815   :  { %v898_v25 = vpop.f32.mrf.mxu3 }
 0x816   :  { %v930_v5 = vmul.f32 %v1862_v21, %v2189_v1  ;;  %v931_v6 = vmul.f32 %v1864_v23, %v2191_v3  ;;  %v906_v11 = vpack.c.bf16 %v898_v25, %v898_v25  ;;  %v928_v22 = vmul.f32 %v1870_v27, %v2189_v1 }
 0x817   :  { %v929_v7 = vmul.f32 %v1872_v28, %v2191_v3  ;;  %v926_v31 = vmul.f32 %v1881_v35, %v2189_v1  ;;  %v927_v32 = vmul.f32 %v1887_v39, %v2191_v3  ;;  %v924_v43 = vmul.f32 %v1900_v45, %v2189_v1 }
 0x818   :  { %v939_v8 = vpack.c.bf16 %v931_v6, %v930_v5  ;;  %v942_v18 = vunpack.c.l.b16 %v906_v11  ;;  %v925_v46 = vmul.f32 %v1906_v49, %v2191_v3  ;;  %v922_v16 = vmul.f32 %v1911_v52, %v2189_v1 }
 0x819   :  { %v938_v20 = vpack.c.bf16 %v929_v7, %v928_v22  ;;  %v937_v36 = vpack.c.bf16 %v927_v32, %v926_v31  ;;  %v923_v50 = vmul.f32 %v1917_v56, %v2191_v3  ;;  %v920_v54 = vmul.f32 %v1926_v60, %v2189_v1 }
 0x81a   :  { %972 = vmatpush.bf16.xpose.msra.mxu0 %v939_v8  ;;  %v921_v57 = vmul.f32 %v1932_v0, %v2191_v3  ;;  %v916_v8 = vmul.f32 %v1952_v13, %v2189_v1  ;;  %v917_v11 = vmul.f32 %v1958_v17, %v2191_v3 }
 0x81b   :  { %v935_v51 = vpack.c.bf16 %v923_v50, %v922_v16 }
 0x81c   :  { %v934_v58 = vpack.c.bf16 %v921_v57, %v920_v54  ;;  %v932_v22 = vpack.c.bf16 %v917_v11, %v916_v8 }
 0x81d   :  { %v900_v14 = vpop.f32.mrf.mxu3 }
 0x81e   :  { %v907_v15 = vpack.c.bf16 %v900_v14, %v900_v14 }
 0x820   :  { %v943_v19 = vunpack.c.l.b16 %v907_v15 }
 0x822   :  { %v944_v24 = vpack.c.b16 %v943_v19, %v942_v18  ;;  %973 = vmatpush.bf16.xpose.msra.mxu0 %v938_v20 }
 0x824   :  { %v946_v29 = vunpack.c.l.bf16 %v944_v24  ;;  %v947_v30 = vunpack.c.h.bf16 %v944_v24  ;;  %v1500_v24 = vld [vmem:[%s2321_s10 + $0x60] sm:$0xff] }
 0x826   :  { %v962_v34 = vmul.f32 %v1862_v21, %v946_v29  ;;  %v963_v26 = vmul.f32 %v1864_v23, %v947_v30  ;;  %v960_v38 = vmul.f32 %v1870_v27, %v946_v29  ;;  %v961_v40 = vmul.f32 %v1872_v28, %v947_v30 }
 0x827   :  { %v958_v47 = vmul.f32 %v1881_v35, %v946_v29  ;;  %v959_v21 = vmul.f32 %v1887_v39, %v947_v30  ;;  %v936_v23 = vpack.c.bf16 %v925_v46, %v924_v43  ;;  %v956_v27 = vmul.f32 %v1900_v45, %v946_v29 }
 0x828   :  { %v971_v37 = vpack.c.bf16 %v963_v26, %v962_v34  ;;  %v970_v44 = vpack.c.bf16 %v961_v40, %v960_v38  ;;  %v957_v28 = vmul.f32 %v1906_v49, %v947_v30  ;;  %v954_v35 = vmul.f32 %v1911_v52, %v946_v29  ;;  %v1498_v34 = vld [vmem:[%s2321_s10 + $0x50] sm:$0xff]  ;;  %v1497_v26 = vld [vmem:[%s2321_s10 + $0x48] sm:$0xff] }
 0x829   :  { %v969_v48 = vpack.c.bf16 %v959_v21, %v958_v47  ;;  %v955_v39 = vmul.f32 %v1917_v56, %v947_v30  ;;  %v952_v45 = vmul.f32 %v1926_v60, %v946_v29  ;;  %v953_v49 = vmul.f32 %v1932_v0, %v947_v30  ;;  %v1505_v21 = vld [vmem:[%s2328_s17 + $0x8] sm:$0xff] }
 0x82a   :  { %974 = vmatpush.bf16.xpose.msra.mxu0 %v937_v36  ;;  %1022 = vmatpush.bf16.msra.mxu2 %v971_v37  ;;  %v968_v33 = vpack.c.bf16 %v957_v28, %v956_v27  ;;  %v950_v52 = vmul.f32 %v1937_v2, %v946_v29  ;;  %v951_v56 = vmul.f32 %v1943_v9, %v947_v30  ;;  %v1496_v36 = vld [vmem:[%s2321_s10 + $0x40] sm:$0xff] }
 0x82b   :  { %v967_v53 = vpack.c.bf16 %v955_v39, %v954_v35  ;;  %v966_v42 = vpack.c.bf16 %v953_v49, %v952_v45  ;;  %v948_v61 = vmul.f32 %v1952_v13, %v946_v29  ;;  %v949_v25 = vmul.f32 %v1958_v17, %v947_v30  ;;  %v1499_v29 = vld [vmem:[%s2321_s10 + $0x58] sm:$0xff]  ;;  %1184 = vmatpush.bf16.msrb.mxu1 %v1505_v21  ;;  %v1560_v27 = vld [vmem:[%s2322_s11 + $0x1] ss:$0 sm:$0xff] }
 0x82c   :  { %v965_v59 = vpack.c.bf16 %v951_v56, %v950_v52  ;;  %v918_v60 = vmul.f32 %v1937_v2, %v2189_v1  ;;  %v919_v0 = vmul.f32 %v1943_v9, %v2191_v3  ;;  %v1562_v56 = vld [vmem:[%s2331_s20] ss:$0 sm:$0xff] }
 0x82d   :  { %v964_v5 = vpack.c.bf16 %v949_v25, %v948_v61 }
 0x82e   :  { %1023 = vmatpush.bf16.msra.mxu2 %v970_v44  ;;  %v933_v6 = vpack.c.bf16 %v919_v0, %v918_v60 }
 0x832   :  { %975 = vmatpush.bf16.xpose.msra.mxu0 %v936_v23  ;;  %1024 = vmatpush.bf16.msra.mxu2 %v969_v48  ;;  %v1504_v23 = vld [vmem:[%s2328_s17] sm:$0xff] }
 0x833   :  { %1185 = vmatpush.bf16.msrb.mxu1 %v1504_v23 }
 0x836   :  { %1025 = vmatpush.bf16.msra.mxu2 %v968_v33 }
 0x83a   :  { %976 = vmatpush.bf16.xpose.msra.mxu0 %v935_v51  ;;  %1026 = vmatpush.bf16.msra.mxu2 %v967_v53  ;;  %v1194_v51 = vld [vmem:[%s2327_s16] sm:$0x3]  ;;  %v1507_v53 = vld [vmem:[%s2330_s19 + $0x8] sm:$0xff] }
 0x83e   :  { %1027 = vmatpush.bf16.msra.mxu2 %v966_v42 }
 0x842   :  { %977 = vmatpush.bf16.xpose.msra.mxu0 %v934_v58  ;;  %1028 = vmatpush.bf16.msra.mxu2 %v965_v59 }
 0x846   :  { %1029 = vmatpush.bf16.msra.mxu2 %v964_v5 }
 0x84a   :  { %978 = vmatpush.bf16.xpose.msra.mxu0 %v933_v6 }
 0x852   :  { %979 = vmatpush.bf16.xpose.msra.mxu0 %v932_v22 }
 0x859   :  { %980 = vmatmul.bf16.vlgmr.msra.gmra.mxu0 %v903_v55  ;;  %v1501_v55 = vld [vmem:[%s2321_s10 + $0x68] sm:$0xff] }
 0x8d6   :  { %v981_v7 = vpop.f32.mrf.mxu0 }
 0x8d7   :  { %v982_v2 = vadd.f32 %v981_v7, %v2017_v63  ;;  %v1503_v63 = vld [vmem:[%s2321_s10 + $0x78] sm:$0xff] }
 0x8d8   :  { %1138 = vmatpush.bf16.msrb.mxu3 %v1503_v63 }
 0x8d9   :  { %986 = vmax.xlane.f32.xlu0 %v982_v2 }
 0x8de   :  { %v983_v9 = vpop.f32.mrf.mxu0 }
 0x8df   :  { %v984_v14 = vadd.f32 %v983_v9, %v2023_v4  ;;  %v1502_v4 = vld [vmem:[%s2321_s10 + $0x70] sm:$0xff] }
 0x8e0   :  { %1139 = vmatpush.bf16.msrb.mxu3 %v1502_v4 }
 0x8e1   :  { %988 = vmax.xlane.f32.xlu1 %v984_v14 }
 0x8e4   :  { %1140 = vmatpush.bf16.msrb.mxu3 %v1501_v55 }
 0x8e8   :  { %1141 = vmatpush.bf16.msrb.mxu3 %v1500_v24 }
 0x8ec   :  { %1142 = vmatpush.bf16.msrb.mxu3 %v1499_v29 }
 0x8f0   :  { %1143 = vmatpush.bf16.msrb.mxu3 %v1498_v34 }
 0x8f4   :  { %1144 = vmatpush.bf16.msrb.mxu3 %v1497_v26 }
 0x8f8   :  { %1145 = vmatpush.bf16.msrb.mxu3 %v1496_v36 }
 0x94c   :  { %v987_v15 = vpop.xlane.xlu0 %986 }
 0x94d   :  { %v990_v18 = vsub.f32 %v982_v2, %v987_v15 }
 0x94f   :  { %v992_v13 = vmul.f32 1.442695, %v990_v18 }
 0x951   :  { %1589 = vpow2.f32 %v992_v13 }
 0x954   :  { %v989_v1 = vpop.xlane.xlu1 %988 }
 0x955   :  { %v991_v17 = vsub.f32 %v984_v14, %v989_v1 }
 0x957   :  { %v1590_v3 = vpop.eup %1589  ;;  %v994_v19 = vmul.f32 1.442695, %v991_v17 }
 0x958   :  { %1012 = vmatmul.f32.vlgmr.msra.gmra.mxu1 %v1590_v3 }
 0x959   :  { %1591 = vpow2.f32 %v994_v19 }
 0x95f   :  { %v1592_v12 = vpop.eup %1591 }
 0x960   :  { %1015 = vmatmul.f32.gmra.mxu1 %v1592_v12  ;;  %v1021_v41 = vpack.c.bf16 %v1592_v12, %v1590_v3 }
 0x962   :  { %1030 = vmatmul.bf16.vlgmr.msra.gmra.mxu2 %v1021_v41 }
 0x9d5   :  { %v1013_v20 = vpop.f32.mrf.mxu1 }
 0x9d6   :  { %1593 = vrcp.f32 %v1013_v20 }
 0x9dc   :  { %v1594_v30 = vpop.eup %1593 }
 0x9dd   :  { %v1016_v31 = vpop.f32.mrf.mxu1  ;;  %1402 = vmatmul.msk.f32.vlgmr.msra.gmra.mxu3 %vm535_vm0, %v1594_v30 }
 0x9de   :  { %1595 = vrcp.f32 %v1016_v31 }
 0x9e4   :  { %v1596_v32 = vpop.eup %1595 }
 0x9e5   :  { %1403 = vmatmul.msk.f32.gmra.mxu3 %vm535_vm0, %v1596_v32  ;;  %v1031_v37 = vpop.f32.mrf.mxu2  ;;  %vm1256_vm0 = vcmask 345088  }
 0x9ed   :  { %v1033_v40 = vpop.f32.mrf.mxu2 }
 0xa60   :  { %v1059_v38 = vpop.f32.mrf.mxu3 }
 0xa61   :  { %v1065_v44 = vmul.f32 %v1059_v38, %v1031_v37 }
 0xa68   :  { %v1062_v43 = vpop.f32.mrf.mxu3 }
 0xa69   :  { %v1066_v46 = vmul.f32 %v1062_v43, %v1033_v40 }
 0xa6b   :  { %v1067_v47 = vpack.c.bf16 %v1066_v46, %v1065_v44 }
 0xa6d   :  { %1146 = vmatmul.bf16.vlgmr.msrb.gmra.mxu3 %v1067_v47 }
 0xaf0   :  { %v1147_v48 = vpop.f32.mrf.mxu3 }
 0xaf1   :  { %v1148_v28 = vadd.f32 %v1560_v27, %v1147_v48 }
 0xaf3   :  { %v1152_v50 = vadd.f32 %v1148_v28, %v2080_v62  ;;  %v1506_v62 = vld [vmem:[%s2330_s19] sm:$0xff] }
 0xaf8   :  { %v1149_v16 = vpop.f32.mrf.mxu3 }
 0xaf9   :  { %v1150_v33 = vadd.f32 %v1560_v27, %v1149_v16 }
 0xafb   :  { %v1153_v35 = vadd.f32 %v1150_v33, %v2088_v10  ;;  %v1561_v10 = vld [vmem:[%s2329_s18] ss:$0 sm:$0xff] }
 0xafd   :  { %v1154_v39 = vpack.c.bf16 %v1153_v35, %v1152_v50  ;;  %1213 = vmatpush.msrb.mxu2 %v1153_v35 }
 0xaff   :  { %1461 = vmatmul.msk.bf16.vlgmr.msrb.gmra.mxu1 %vm136_vm2, %v1154_v39  ;;  %1214 = vmatpush.msrb.mxu2 %v1152_v50 }
 0xb00   :  { %1462 = vmatmul.msk.f32.vlgmr.msrb.gmra.mxu2 %vm1195_vm15, %v1194_v51 }
 0xb01   :  { %1249 = vmatpush.bf16.msra.mxu2 %v1507_v53 }
 0xb05   :  { %1250 = vmatpush.bf16.msra.mxu2 %v1506_v62 }
 0xb7c   :  { %v1187_v45 = vpop.f32.mrf.mxu1 }
 0xb7d   :  { %v1188_v49 = vadd.f32 %v1561_v10, %v1187_v45 }
 0xb7f   :  { %1192 = vst.msk [vmem:[%s2332_s21] sm:$0xff] %vm77_vm1, %v1188_v49 }
 0xb83   :  { %v1216_v54 = vpop.f32.mrf.mxu2 }
 0xb84   :  { %v1189_v42 = vpop.f32.mrf.mxu1  ;;  %v1219_v57 = vpack.c.bf16 %v1216_v54, %v1216_v54 }
 0xb85   :  { %v1190_v52 = vadd.f32 %v1561_v10, %v1189_v42 }
 0xb86   :  { %1471 = vmatmul.msk.bf16.vlgmr.msra.gmra.mxu2 %vm136_vm2, %v1219_v57 }
 0xb87   :  { %1193 = vst.msk [vmem:[%s2332_s21 + $0x8] sm:$0xff] %vm77_vm1, %v1190_v52 }
 0xc09   :  { %v1252_v58 = vpop.f32.mrf.mxu2 }
 0xc0a   :  { %v1253_v59 = vadd.f32 %v1562_v56, %v1252_v58 }
 0xc0c   :  { %1257 = vst.msk [vmem:[#allocation2] sm:$0x3] %vm1256_vm0, %v1253_v59 }
 0xc0d   :  { %1270 = dma.vmem_to_hbm [thread:$0]  %s1266_s28, 32, %s1268_s4, [#allocation3]  }
 0xc11   :  { %v1254_v61 = vpop.f32.mrf.mxu2 }
 0xc12   :  { %1621 = dma.done.wait [#allocation3], 32  }
 0xc13   :  { %1622 = vsyncadd [#allocation3], 4294967264 }
 0xc14   :  { %1277 = vsyncpa [#allocation3], 1 }

</bundles_post_ra>
